<compile_context>
chip_gen: v7x
topology: tpu7x:2x2x1
jax: 0.10.0
libtpu: 0.0.40
codegen_flags: <defaults>
</compile_context>

<pallas_src>
import functools

import jax
import jax.numpy as jnp
from jax import lax
from jax.experimental import pallas as pl
from jax.experimental.pallas import tpu as pltpu


def _lstm_net_kernel(num_layers, seq_len, hidden_dim, batch_tile, *refs):
    """refs = (x_ref,
               [w_ih_T, w_hh_T, bias] * num_layers,
               w_fc_T, b_fc,
               out_ref,
               xflat_ref, gx_ref, hseq_ref)"""
    x_ref = refs[0]                              # (T, TB, D) f32
    w_fc_ref = refs[1 + 3 * num_layers]          # (H, C_pad) bf16
    b_fc_ref = refs[2 + 3 * num_layers]          # (1, C_pad) f32
    out_ref = refs[3 + 3 * num_layers]           # (TB, C_pad) f32
    xflat_ref = refs[4 + 3 * num_layers]         # (T*TB, D)  f32 scratch
    gx_ref = refs[5 + 3 * num_layers]            # (T*TB, 4H) f32 scratch
    hseq_ref = refs[6 + 3 * num_layers]          # (T*TB, H)  f32 scratch

    H = hidden_dim
    T = seq_len
    TB = batch_tile
    unrolled = T <= 32                           # T=8 here -> fully unrolled

    # Stage the time-major input block into a flat (T*TB, D) scratch once.
    if unrolled:
        for t in range(T):
            xflat_ref[pl.ds(t * TB, TB), :] = x_ref[t]
    else:
        def _copy(t, carry):
            xflat_ref[pl.ds(t * TB, TB), :] = x_ref[t]
            return carry
        lax.fori_loop(0, T, _copy, 0)

    h_last = None
    for l in range(num_layers):
        w_ih_t = refs[1 + 3 * l][...]            # (in_l, 4H) bf16
        w_hh_t = refs[2 + 3 * l][...]            # (H,    4H) bf16
        bias = refs[3 + 3 * l][...]              # (1,    4H) f32  (b_ih+b_hh)

        # One big MXU contraction for the whole sequence's input projection,
        # bias fused, hoisted off the recurrent critical path.
        if l == 0:
            inp_seq = xflat_ref[...].astype(jnp.bfloat16)
        else:
            inp_seq = hseq_ref[...].astype(jnp.bfloat16)
        gx_ref[...] = (
            jnp.dot(inp_seq, w_ih_t, preferred_element_type=jnp.float32) + bias
        )

        write_hseq = l < num_layers - 1

        def step(t, carry, w_hh_t=w_hh_t, write_hseq=write_hseq):
            h, c = carry
            # Only this (TB,H)@(H,4H) dot is on the sequential chain.
            gates = gx_ref[pl.ds(t * TB, TB), :] + jnp.dot(
                h.astype(jnp.bfloat16), w_hh_t,
                preferred_element_type=jnp.float32)
            i_g = jax.nn.sigmoid(gates[:, 0 * H:1 * H])
            f_g = jax.nn.sigmoid(gates[:, 1 * H:2 * H])
            g_g = jnp.tanh(gates[:, 2 * H:3 * H])
            o_g = jax.nn.sigmoid(gates[:, 3 * H:4 * H])
            c_new = f_g * c + i_g * g_g
            h_new = o_g * jnp.tanh(c_new)
            if write_hseq:                       # feed the next layer
                hseq_ref[pl.ds(t * TB, TB), :] = h_new
            return (h_new, c_new)

        h0 = jnp.zeros((TB, H), jnp.float32)
        c0 = jnp.zeros((TB, H), jnp.float32)
        if unrolled:
            carry = (h0, c0)
            for t in range(T):                   # fully unrolled recurrence
                carry = step(t, carry)
            h_last = carry[0]
        else:
            h_last, _ = lax.fori_loop(0, T, step, (h0, c0), unroll=4)

    # Final Linear on the top layer's last hidden state (lane-padded classes).
    out_ref[...] = (
        jnp.dot(h_last.astype(jnp.bfloat16), w_fc_ref[...],
                preferred_element_type=jnp.float32)
        + b_fc_ref[...]
    ).astype(out_ref.dtype)


def lstm_net_forward(x, params, *, num_layers, hidden_dim, num_classes,
                     batch_tile=None):
    """x: (B, T, input_dim) float32. Returns (B, num_classes) float32."""
    B, T, D = x.shape
    H = hidden_dim
    TB = min(B, 8) if batch_tile is None else batch_tile
    n_blocks = pl.cdiv(B, TB)
    C_pad = ((num_classes + 127) // 128) * 128   # lane-dense output slab

    x_tm = jnp.transpose(x, (1, 0, 2))           # (T, B, D) time-major

    inputs = [x_tm]
    in_specs = [pl.BlockSpec((T, TB, D), lambda b: (0, b, 0))]
    for l in range(num_layers):
        w_ih, w_hh, b_ih, b_hh = params["layers"][l]
        in_l = w_ih.shape[1]
        inputs += [
            w_ih.T.astype(jnp.bfloat16),                   # (in_l, 4H)
            w_hh.T.astype(jnp.bfloat16),                   # (H,    4H)
            (b_ih + b_hh)[None, :].astype(jnp.float32),    # (1,    4H)
        ]
        in_specs += [
            pl.BlockSpec((in_l, 4 * H), lambda b: (0, 0)),
            pl.BlockSpec((H, 4 * H), lambda b: (0, 0)),
            pl.BlockSpec((1, 4 * H), lambda b: (0, 0)),
        ]

    w_fc, b_fc = params["fc"]
    w_fc_t = jnp.zeros((H, C_pad), jnp.bfloat16).at[:, :num_classes].set(
        w_fc.T.astype(jnp.bfloat16))
    b_fc_p = jnp.zeros((1, C_pad), jnp.float32).at[0, :num_classes].set(
        b_fc.astype(jnp.float32))
    inputs += [w_fc_t, b_fc_p]
    in_specs += [pl.BlockSpec((H, C_pad), lambda b: (0, 0)),
                 pl.BlockSpec((1, C_pad), lambda b: (0, 0))]

    kernel = functools.partial(_lstm_net_kernel, num_layers, T, H, TB)
    out_padded = pl.pallas_call(
        kernel,
        out_shape=jax.ShapeDtypeStruct((B, C_pad), jnp.float32),
        grid=(n_blocks,),
        in_specs=in_specs,
        out_specs=pl.BlockSpec((TB, C_pad), lambda b: (b, 0)),
        scratch_shapes=[
            pltpu.VMEM((T * TB, D), jnp.float32),        # staged input seq
            pltpu.VMEM((T * TB, 4 * H), jnp.float32),    # hoisted input gates
            pltpu.VMEM((T * TB, H), jnp.float32),        # layer h-sequence
        ],
        compiler_params=pltpu.CompilerParams(
            dimension_semantics=("parallel",),           # v7x: use both TCs
            vmem_limit_bytes=32 * 1024 * 1024,
        ),
    )(*inputs)
    return out_padded[:, :num_classes]


def init_params(key, input_dim, hidden_dim, num_layers, num_classes):
    """Deterministic init mirroring PyTorch's U(-1/sqrt(H), 1/sqrt(H))."""
    k = 1.0 / jnp.sqrt(jnp.float32(hidden_dim))
    layers = []
    for l in range(num_layers):
        in_dim = input_dim if l == 0 else hidden_dim
        key, k1, k2, k3, k4 = jax.random.split(key, 5)
        w_ih = jax.random.uniform(k1, (4 * hidden_dim, in_dim), jnp.float32, -k, k)
        w_hh = jax.random.uniform(k2, (4 * hidden_dim, hidden_dim), jnp.float32, -k, k)
        b_ih = jax.random.uniform(k3, (4 * hidden_dim,), jnp.float32, -k, k)
        b_hh = jax.random.uniform(k4, (4 * hidden_dim,), jnp.float32, -k, k)
        layers.append((w_ih, w_hh, b_ih, b_hh))
    key, k5, k6 = jax.random.split(key, 3)
    kf = 1.0 / jnp.sqrt(jnp.float32(hidden_dim))
    w_fc = jax.random.uniform(k5, (num_classes, hidden_dim), jnp.float32, -kf, kf)
    b_fc = jax.random.uniform(k6, (num_classes,), jnp.float32, -kf, kf)
    return {"layers": layers, "fc": (w_fc, b_fc)}


if __name__ == "__main__":
    # Small shapes consistent with the module's forward:
    B, T, INPUT_DIM = 2, 8, 16
    HIDDEN_DIM, NUM_LAYERS, NUM_CLASSES = 32, 2, 3

    key = jax.random.PRNGKey(0)
    key, kx = jax.random.split(key)
    x = jax.random.normal(kx, (B, T, INPUT_DIM), jnp.float32)

    params = init_params(key, INPUT_DIM, HIDDEN_DIM, NUM_LAYERS, NUM_CLASSES)

    out = lstm_net_forward(
        x, params,
        num_layers=NUM_LAYERS, hidden_dim=HIDDEN_DIM, num_classes=NUM_CLASSES,
    )
    out = jax.block_until_ready(out)
    assert out.shape == (B, NUM_CLASSES) and out.dtype == jnp.float32
    print("KERNEL_OK")
</pallas_src>

<mosaic_0001>
module attributes {stable_mosaic.version = 11 : i64} {
  func.func @_lstm_net_kernel(%arg0: i32, %arg1: memref<8x2x16xf32, #tpu.memory_space<vmem>>, %arg2: memref<16x128xbf16, #tpu.memory_space<vmem>>, %arg3: memref<32x128xbf16, #tpu.memory_space<vmem>>, %arg4: memref<1x128xf32, #tpu.memory_space<vmem>>, %arg5: memref<32x128xbf16, #tpu.memory_space<vmem>>, %arg6: memref<32x128xbf16, #tpu.memory_space<vmem>>, %arg7: memref<1x128xf32, #tpu.memory_space<vmem>>, %arg8: memref<32x128xbf16, #tpu.memory_space<vmem>>, %arg9: memref<1x128xf32, #tpu.memory_space<vmem>>, %arg10: memref<2x128xf32, #tpu.memory_space<vmem>>, %arg11: memref<16x16xf32, #tpu.memory_space<vmem>>, %arg12: memref<16x128xf32, #tpu.memory_space<vmem>>, %arg13: memref<16x32xf32, #tpu.memory_space<vmem>>) attributes {dimension_semantics = [#tpu.dimension_semantics<parallel>], iteration_bounds = array<i64: 1>, scalar_prefetch = 0 : i64, scratch_operands = 3 : i64, tpu.core_type = #tpu.core_type<tc>, window_params = [{transform_indices = @transform_0, window_bounds = array<i64: 8, 2, 16>}, {pipeline_mode = #tpu.pipeline_mode<synchronous>, transform_indices = @transform_1, window_bounds = array<i64: 16, 128>}, {pipeline_mode = #tpu.pipeline_mode<synchronous>, transform_indices = @transform_2, window_bounds = array<i64: 32, 128>}, {pipeline_mode = #tpu.pipeline_mode<synchronous>, transform_indices = @transform_3, window_bounds = array<i64: 1, 128>}, {pipeline_mode = #tpu.pipeline_mode<synchronous>, transform_indices = @transform_4, window_bounds = array<i64: 32, 128>}, {pipeline_mode = #tpu.pipeline_mode<synchronous>, transform_indices = @transform_5, window_bounds = array<i64: 32, 128>}, {pipeline_mode = #tpu.pipeline_mode<synchronous>, transform_indices = @transform_6, window_bounds = array<i64: 1, 128>}, {pipeline_mode = #tpu.pipeline_mode<synchronous>, transform_indices = @transform_7, window_bounds = array<i64: 32, 128>}, {pipeline_mode = #tpu.pipeline_mode<synchronous>, transform_indices = @transform_8, window_bounds = array<i64: 1, 128>}, {transform_indices = @transform_9, window_bounds = array<i64: 2, 128>}]} {
    %c0 = arith.constant 0 : index
    %c0_0 = arith.constant 0 : index
    %c0_1 = arith.constant 0 : index
    %0 = vector.load %arg1[%c0, %c0_0, %c0_1] : memref<8x2x16xf32, #tpu.memory_space<vmem>>, vector<1x2x16xf32>
    %1 = vector.shape_cast %0 : vector<1x2x16xf32> to vector<2x16xf32>
    %c0_2 = arith.constant 0 : index
    %c0_3 = arith.constant 0 : index
    %2 = vector.load %arg11[%c0_2, %c0_3] : memref<16x16xf32, #tpu.memory_space<vmem>>, vector<2x16xf32>
    tpu.vector_store %arg11[%c0_2, %c0_3], %1 {strides = array<i32>} : memref<16x16xf32, #tpu.memory_space<vmem>>, vector<2x16xf32>,
    %c1 = arith.constant 1 : index
    %c0_4 = arith.constant 0 : index
    %c0_5 = arith.constant 0 : index
    %3 = vector.load %arg1[%c1, %c0_4, %c0_5] : memref<8x2x16xf32, #tpu.memory_space<vmem>>, vector<1x2x16xf32>
    %4 = vector.shape_cast %3 : vector<1x2x16xf32> to vector<2x16xf32>
    %c2 = arith.constant 2 : index
    %c0_6 = arith.constant 0 : index
    %5 = vector.load %arg11[%c2, %c0_6] : memref<16x16xf32, #tpu.memory_space<vmem>>, vector<2x16xf32>
    tpu.vector_store %arg11[%c2, %c0_6], %4 {strides = array<i32>} : memref<16x16xf32, #tpu.memory_space<vmem>>, vector<2x16xf32>,
    %c2_7 = arith.constant 2 : index
    %c0_8 = arith.constant 0 : index
    %c0_9 = arith.constant 0 : index
    %6 = vector.load %arg1[%c2_7, %c0_8, %c0_9] : memref<8x2x16xf32, #tpu.memory_space<vmem>>, vector<1x2x16xf32>
    %7 = vector.shape_cast %6 : vector<1x2x16xf32> to vector<2x16xf32>
    %c4 = arith.constant 4 : index
    %c0_10 = arith.constant 0 : index
    %8 = vector.load %arg11[%c4, %c0_10] : memref<16x16xf32, #tpu.memory_space<vmem>>, vector<2x16xf32>
    tpu.vector_store %arg11[%c4, %c0_10], %7 {strides = array<i32>} : memref<16x16xf32, #tpu.memory_space<vmem>>, vector<2x16xf32>,
    %c3 = arith.constant 3 : index
    %c0_11 = arith.constant 0 : index
    %c0_12 = arith.constant 0 : index
    %9 = vector.load %arg1[%c3, %c0_11, %c0_12] : memref<8x2x16xf32, #tpu.memory_space<vmem>>, vector<1x2x16xf32>
    %10 = vector.shape_cast %9 : vector<1x2x16xf32> to vector<2x16xf32>
    %c6 = arith.constant 6 : index
    %c0_13 = arith.constant 0 : index
    %11 = vector.load %arg11[%c6, %c0_13] : memref<16x16xf32, #tpu.memory_space<vmem>>, vector<2x16xf32>
    tpu.vector_store %arg11[%c6, %c0_13], %10 {strides = array<i32>} : memref<16x16xf32, #tpu.memory_space<vmem>>, vector<2x16xf32>,
    %c4_14 = arith.constant 4 : index
    %c0_15 = arith.constant 0 : index
    %c0_16 = arith.constant 0 : index
    %12 = vector.load %arg1[%c4_14, %c0_15, %c0_16] : memref<8x2x16xf32, #tpu.memory_space<vmem>>, vector<1x2x16xf32>
    %13 = vector.shape_cast %12 : vector<1x2x16xf32> to vector<2x16xf32>
    %c8 = arith.constant 8 : index
    %c0_17 = arith.constant 0 : index
    %14 = vector.load %arg11[%c8, %c0_17] : memref<16x16xf32, #tpu.memory_space<vmem>>, vector<2x16xf32>
    tpu.vector_store %arg11[%c8, %c0_17], %13 {strides = array<i32>} : memref<16x16xf32, #tpu.memory_space<vmem>>, vector<2x16xf32>,
    %c5 = arith.constant 5 : index
    %c0_18 = arith.constant 0 : index
    %c0_19 = arith.constant 0 : index
    %15 = vector.load %arg1[%c5, %c0_18, %c0_19] : memref<8x2x16xf32, #tpu.memory_space<vmem>>, vector<1x2x16xf32>
    %16 = vector.shape_cast %15 : vector<1x2x16xf32> to vector<2x16xf32>
    %c10 = arith.constant 10 : index
    %c0_20 = arith.constant 0 : index
    %17 = vector.load %arg11[%c10, %c0_20] : memref<16x16xf32, #tpu.memory_space<vmem>>, vector<2x16xf32>
    tpu.vector_store %arg11[%c10, %c0_20], %16 {strides = array<i32>} : memref<16x16xf32, #tpu.memory_space<vmem>>, vector<2x16xf32>,
    %c6_21 = arith.constant 6 : index
    %c0_22 = arith.constant 0 : index
    %c0_23 = arith.constant 0 : index
    %18 = vector.load %arg1[%c6_21, %c0_22, %c0_23] : memref<8x2x16xf32, #tpu.memory_space<vmem>>, vector<1x2x16xf32>
    %19 = vector.shape_cast %18 : vector<1x2x16xf32> to vector<2x16xf32>
    %c12 = arith.constant 12 : index
    %c0_24 = arith.constant 0 : index
    %20 = vector.load %arg11[%c12, %c0_24] : memref<16x16xf32, #tpu.memory_space<vmem>>, vector<2x16xf32>
    tpu.vector_store %arg11[%c12, %c0_24], %19 {strides = array<i32>} : memref<16x16xf32, #tpu.memory_space<vmem>>, vector<2x16xf32>,
    %c7 = arith.constant 7 : index
    %c0_25 = arith.constant 0 : index
    %c0_26 = arith.constant 0 : index
    %21 = vector.load %arg1[%c7, %c0_25, %c0_26] : memref<8x2x16xf32, #tpu.memory_space<vmem>>, vector<1x2x16xf32>
    %22 = vector.shape_cast %21 : vector<1x2x16xf32> to vector<2x16xf32>
    %c14 = arith.constant 14 : index
    %c0_27 = arith.constant 0 : index
    %23 = vector.load %arg11[%c14, %c0_27] : memref<16x16xf32, #tpu.memory_space<vmem>>, vector<2x16xf32>
    tpu.vector_store %arg11[%c14, %c0_27], %22 {strides = array<i32>} : memref<16x16xf32, #tpu.memory_space<vmem>>, vector<2x16xf32>,
    %c0_28 = arith.constant 0 : index
    %c0_29 = arith.constant 0 : index
    %24 = vector.load %arg2[%c0_28, %c0_29] : memref<16x128xbf16, #tpu.memory_space<vmem>>, vector<16x128xbf16>
    %c0_30 = arith.constant 0 : index
    %c0_31 = arith.constant 0 : index
    %25 = vector.load %arg3[%c0_30, %c0_31] : memref<32x128xbf16, #tpu.memory_space<vmem>>, vector<32x128xbf16>
    %c0_32 = arith.constant 0 : index
    %c0_33 = arith.constant 0 : index
    %26 = vector.load %arg4[%c0_32, %c0_33] : memref<1x128xf32, #tpu.memory_space<vmem>>, vector<1x128xf32>
    %c0_34 = arith.constant 0 : index
    %c0_35 = arith.constant 0 : index
    %27 = vector.load %arg11[%c0_34, %c0_35] : memref<16x16xf32, #tpu.memory_space<vmem>>, vector<16x16xf32>
    %28 = arith.truncf %27 : vector<16x16xf32> to vector<16x16xbf16>
    %cst = arith.constant dense<0.000000e+00> : vector<16x128xf32>
    %29 = tpu.matmul %28, %24, %cst {dimension_numbers = #tpu.dot_dimension_numbers<[1], [0], [0], [1], [0, 0, 1, 1], [], []>} : vector<16x16xbf16>, vector<16x128xbf16>, vector<16x128xf32> -> vector<16x128xf32>
    %30 = vector.broadcast %26 : vector<1x128xf32> to vector<16x128xf32>
    %31 = arith.addf %29, %30 : vector<16x128xf32>
    %c0_36 = arith.constant 0 : index
    %c0_37 = arith.constant 0 : index
    %32 = vector.load %arg12[%c0_36, %c0_37] : memref<16x128xf32, #tpu.memory_space<vmem>>, vector<16x128xf32>
    tpu.vector_store %arg12[%c0_36, %c0_37], %31 {strides = array<i32>} : memref<16x128xf32, #tpu.memory_space<vmem>>, vector<16x128xf32>,
    %cst_38 = arith.constant 0.000000e+00 : f32
    %33 = vector.broadcast %cst_38 : f32 to vector<2x32xf32>
    %cst_39 = arith.constant 0.000000e+00 : f32
    %34 = vector.broadcast %cst_39 : f32 to vector<2x32xf32>
    %c0_40 = arith.constant 0 : index
    %c0_41 = arith.constant 0 : index
    %35 = vector.load %arg12[%c0_40, %c0_41] : memref<16x128xf32, #tpu.memory_space<vmem>>, vector<2x128xf32>
    %36 = arith.truncf %33 : vector<2x32xf32> to vector<2x32xbf16>
    %cst_42 = arith.constant dense<0.000000e+00> : vector<2x128xf32>
    %37 = tpu.matmul %36, %25, %cst_42 {dimension_numbers = #tpu.dot_dimension_numbers<[1], [0], [0], [1], [0, 0, 1, 1], [], []>} : vector<2x32xbf16>, vector<32x128xbf16>, vector<2x128xf32> -> vector<2x128xf32>
    %38 = arith.addf %35, %37 : vector<2x128xf32>
    %39 = vector.extract_strided_slice %38 {offsets = [0, 0], sizes = [2, 32], strides = [1, 1]} : vector<2x128xf32> to vector<2x32xf32>
    %40 = arith.negf %39 : vector<2x32xf32>
    %41 = math.exp %40 : vector<2x32xf32>
    %cst_43 = arith.constant 1.000000e+00 : f32
    %42 = vector.broadcast %cst_43 : f32 to vector<2x32xf32>
    %43 = arith.addf %42, %41 : vector<2x32xf32>
    %44 = arith.divf %42, %43 : vector<2x32xf32>
    %45 = vector.extract_strided_slice %38 {offsets = [0, 32], sizes = [2, 32], strides = [1, 1]} : vector<2x128xf32> to vector<2x32xf32>
    %46 = arith.negf %45 : vector<2x32xf32>
    %47 = math.exp %46 : vector<2x32xf32>
    %cst_44 = arith.constant 1.000000e+00 : f32
    %48 = vector.broadcast %cst_44 : f32 to vector<2x32xf32>
    %49 = arith.addf %48, %47 : vector<2x32xf32>
    %50 = arith.divf %48, %49 : vector<2x32xf32>
    %51 = vector.extract_strided_slice %38 {offsets = [0, 64], sizes = [2, 32], strides = [1, 1]} : vector<2x128xf32> to vector<2x32xf32>
    %52 = math.tanh %51 : vector<2x32xf32>
    %53 = vector.extract_strided_slice %38 {offsets = [0, 96], sizes = [2, 32], strides = [1, 1]} : vector<2x128xf32> to vector<2x32xf32>
    %54 = arith.negf %53 : vector<2x32xf32>
    %55 = math.exp %54 : vector<2x32xf32>
    %cst_45 = arith.constant 1.000000e+00 : f32
    %56 = vector.broadcast %cst_45 : f32 to vector<2x32xf32>
    %57 = arith.addf %56, %55 : vector<2x32xf32>
    %58 = arith.divf %56, %57 : vector<2x32xf32>
    %59 = arith.mulf %50, %34 : vector<2x32xf32>
    %60 = arith.mulf %44, %52 : vector<2x32xf32>
    %61 = arith.addf %59, %60 : vector<2x32xf32>
    %62 = math.tanh %61 : vector<2x32xf32>
    %63 = arith.mulf %58, %62 : vector<2x32xf32>
    %c0_46 = arith.constant 0 : index
    %c0_47 = arith.constant 0 : index
    %64 = vector.load %arg13[%c0_46, %c0_47] : memref<16x32xf32, #tpu.memory_space<vmem>>, vector<2x32xf32>
    tpu.vector_store %arg13[%c0_46, %c0_47], %63 {strides = array<i32>} : memref<16x32xf32, #tpu.memory_space<vmem>>, vector<2x32xf32>,
    %c2_48 = arith.constant 2 : index
    %c0_49 = arith.constant 0 : index
    %65 = vector.load %arg12[%c2_48, %c0_49] : memref<16x128xf32, #tpu.memory_space<vmem>>, vector<2x128xf32>
    %66 = arith.truncf %63 : vector<2x32xf32> to vector<2x32xbf16>
    %cst_50 = arith.constant dense<0.000000e+00> : vector<2x128xf32>
    %67 = tpu.matmul %66, %25, %cst_50 {dimension_numbers = #tpu.dot_dimension_numbers<[1], [0], [0], [1], [0, 0, 1, 1], [], []>} : vector<2x32xbf16>, vector<32x128xbf16>, vector<2x128xf32> -> vector<2x128xf32>
    %68 = arith.addf %65, %67 : vector<2x128xf32>
    %69 = vector.extract_strided_slice %68 {offsets = [0, 0], sizes = [2, 32], strides = [1, 1]} : vector<2x128xf32> to vector<2x32xf32>
    %70 = arith.negf %69 : vector<2x32xf32>
    %71 = math.exp %70 : vector<2x32xf32>
    %cst_51 = arith.constant 1.000000e+00 : f32
    %72 = vector.broadcast %cst_51 : f32 to vector<2x32xf32>
    %73 = arith.addf %72, %71 : vector<2x32xf32>
    %74 = arith.divf %72, %73 : vector<2x32xf32>
    %75 = vector.extract_strided_slice %68 {offsets = [0, 32], sizes = [2, 32], strides = [1, 1]} : vector<2x128xf32> to vector<2x32xf32>
    %76 = arith.negf %75 : vector<2x32xf32>
    %77 = math.exp %76 : vector<2x32xf32>
    %cst_52 = arith.constant 1.000000e+00 : f32
    %78 = vector.broadcast %cst_52 : f32 to vector<2x32xf32>
    %79 = arith.addf %78, %77 : vector<2x32xf32>
    %80 = arith.divf %78, %79 : vector<2x32xf32>
    %81 = vector.extract_strided_slice %68 {offsets = [0, 64], sizes = [2, 32], strides = [1, 1]} : vector<2x128xf32> to vector<2x32xf32>
    %82 = math.tanh %81 : vector<2x32xf32>
    %83 = vector.extract_strided_slice %68 {offsets = [0, 96], sizes = [2, 32], strides = [1, 1]} : vector<2x128xf32> to vector<2x32xf32>
    %84 = arith.negf %83 : vector<2x32xf32>
    %85 = math.exp %84 : vector<2x32xf32>
    %cst_53 = arith.constant 1.000000e+00 : f32
    %86 = vector.broadcast %cst_53 : f32 to vector<2x32xf32>
    %87 = arith.addf %86, %85 : vector<2x32xf32>
    %88 = arith.divf %86, %87 : vector<2x32xf32>
    %89 = arith.mulf %80, %61 : vector<2x32xf32>
    %90 = arith.mulf %74, %82 : vector<2x32xf32>
    %91 = arith.addf %89, %90 : vector<2x32xf32>
    %92 = math.tanh %91 : vector<2x32xf32>
    %93 = arith.mulf %88, %92 : vector<2x32xf32>
    %c2_54 = arith.constant 2 : index
    %c0_55 = arith.constant 0 : index
    %94 = vector.load %arg13[%c2_54, %c0_55] : memref<16x32xf32, #tpu.memory_space<vmem>>, vector<2x32xf32>
    tpu.vector_store %arg13[%c2_54, %c0_55], %93 {strides = array<i32>} : memref<16x32xf32, #tpu.memory_space<vmem>>, vector<2x32xf32>,
    %c4_56 = arith.constant 4 : index
    %c0_57 = arith.constant 0 : index
    %95 = vector.load %arg12[%c4_56, %c0_57] : memref<16x128xf32, #tpu.memory_space<vmem>>, vector<2x128xf32>
    %96 = arith.truncf %93 : vector<2x32xf32> to vector<2x32xbf16>
    %cst_58 = arith.constant dense<0.000000e+00> : vector<2x128xf32>
    %97 = tpu.matmul %96, %25, %cst_58 {dimension_numbers = #tpu.dot_dimension_numbers<[1], [0], [0], [1], [0, 0, 1, 1], [], []>} : vector<2x32xbf16>, vector<32x128xbf16>, vector<2x128xf32> -> vector<2x128xf32>
    %98 = arith.addf %95, %97 : vector<2x128xf32>
    %99 = vector.extract_strided_slice %98 {offsets = [0, 0], sizes = [2, 32], strides = [1, 1]} : vector<2x128xf32> to vector<2x32xf32>
    %100 = arith.negf %99 : vector<2x32xf32>
    %101 = math.exp %100 : vector<2x32xf32>
    %cst_59 = arith.constant 1.000000e+00 : f32
    %102 = vector.broadcast %cst_59 : f32 to vector<2x32xf32>
    %103 = arith.addf %102, %101 : vector<2x32xf32>
    %104 = arith.divf %102, %103 : vector<2x32xf32>
    %105 = vector.extract_strided_slice %98 {offsets = [0, 32], sizes = [2, 32], strides = [1, 1]} : vector<2x128xf32> to vector<2x32xf32>
    %106 = arith.negf %105 : vector<2x32xf32>
    %107 = math.exp %106 : vector<2x32xf32>
    %cst_60 = arith.constant 1.000000e+00 : f32
    %108 = vector.broadcast %cst_60 : f32 to vector<2x32xf32>
    %109 = arith.addf %108, %107 : vector<2x32xf32>
    %110 = arith.divf %108, %109 : vector<2x32xf32>
    %111 = vector.extract_strided_slice %98 {offsets = [0, 64], sizes = [2, 32], strides = [1, 1]} : vector<2x128xf32> to vector<2x32xf32>
    %112 = math.tanh %111 : vector<2x32xf32>
    %113 = vector.extract_strided_slice %98 {offsets = [0, 96], sizes = [2, 32], strides = [1, 1]} : vector<2x128xf32> to vector<2x32xf32>
    %114 = arith.negf %113 : vector<2x32xf32>
    %115 = math.exp %114 : vector<2x32xf32>
    %cst_61 = arith.constant 1.000000e+00 : f32
    %116 = vector.broadcast %cst_61 : f32 to vector<2x32xf32>
    %117 = arith.addf %116, %115 : vector<2x32xf32>
    %118 = arith.divf %116, %117 : vector<2x32xf32>
    %119 = arith.mulf %110, %91 : vector<2x32xf32>
    %120 = arith.mulf %104, %112 : vector<2x32xf32>
    %121 = arith.addf %119, %120 : vector<2x32xf32>
    %122 = math.tanh %121 : vector<2x32xf32>
    %123 = arith.mulf %118, %122 : vector<2x32xf32>
    %c4_62 = arith.constant 4 : index
    %c0_63 = arith.constant 0 : index
    %124 = vector.load %arg13[%c4_62, %c0_63] : memref<16x32xf32, #tpu.memory_space<vmem>>, vector<2x32xf32>
    tpu.vector_store %arg13[%c4_62, %c0_63], %123 {strides = array<i32>} : memref<16x32xf32, #tpu.memory_space<vmem>>, vector<2x32xf32>,
    %c6_64 = arith.constant 6 : index
    %c0_65 = arith.constant 0 : index
    %125 = vector.load %arg12[%c6_64, %c0_65] : memref<16x128xf32, #tpu.memory_space<vmem>>, vector<2x128xf32>
    %126 = arith.truncf %123 : vector<2x32xf32> to vector<2x32xbf16>
    %cst_66 = arith.constant dense<0.000000e+00> : vector<2x128xf32>
    %127 = tpu.matmul %126, %25, %cst_66 {dimension_numbers = #tpu.dot_dimension_numbers<[1], [0], [0], [1], [0, 0, 1, 1], [], []>} : vector<2x32xbf16>, vector<32x128xbf16>, vector<2x128xf32> -> vector<2x128xf32>
    %128 = arith.addf %125, %127 : vector<2x128xf32>
    %129 = vector.extract_strided_slice %128 {offsets = [0, 0], sizes = [2, 32], strides = [1, 1]} : vector<2x128xf32> to vector<2x32xf32>
    %130 = arith.negf %129 : vector<2x32xf32>
    %131 = math.exp %130 : vector<2x32xf32>
    %cst_67 = arith.constant 1.000000e+00 : f32
    %132 = vector.broadcast %cst_67 : f32 to vector<2x32xf32>
    %133 = arith.addf %132, %131 : vector<2x32xf32>
    %134 = arith.divf %132, %133 : vector<2x32xf32>
    %135 = vector.extract_strided_slice %128 {offsets = [0, 32], sizes = [2, 32], strides = [1, 1]} : vector<2x128xf32> to vector<2x32xf32>
    %136 = arith.negf %135 : vector<2x32xf32>
    %137 = math.exp %136 : vector<2x32xf32>
    %cst_68 = arith.constant 1.000000e+00 : f32
    %138 = vector.broadcast %cst_68 : f32 to vector<2x32xf32>
    %139 = arith.addf %138, %137 : vector<2x32xf32>
    %140 = arith.divf %138, %139 : vector<2x32xf32>
    %141 = vector.extract_strided_slice %128 {offsets = [0, 64], sizes = [2, 32], strides = [1, 1]} : vector<2x128xf32> to vector<2x32xf32>
    %142 = math.tanh %141 : vector<2x32xf32>
    %143 = vector.extract_strided_slice %128 {offsets = [0, 96], sizes = [2, 32], strides = [1, 1]} : vector<2x128xf32> to vector<2x32xf32>
    %144 = arith.negf %143 : vector<2x32xf32>
    %145 = math.exp %144 : vector<2x32xf32>
    %cst_69 = arith.constant 1.000000e+00 : f32
    %146 = vector.broadcast %cst_69 : f32 to vector<2x32xf32>
    %147 = arith.addf %146, %145 : vector<2x32xf32>
    %148 = arith.divf %146, %147 : vector<2x32xf32>
    %149 = arith.mulf %140, %121 : vector<2x32xf32>
    %150 = arith.mulf %134, %142 : vector<2x32xf32>
    %151 = arith.addf %149, %150 : vector<2x32xf32>
    %152 = math.tanh %151 : vector<2x32xf32>
    %153 = arith.mulf %148, %152 : vector<2x32xf32>
    %c6_70 = arith.constant 6 : index
    %c0_71 = arith.constant 0 : index
    %154 = vector.load %arg13[%c6_70, %c0_71] : memref<16x32xf32, #tpu.memory_space<vmem>>, vector<2x32xf32>
    tpu.vector_store %arg13[%c6_70, %c0_71], %153 {strides = array<i32>} : memref<16x32xf32, #tpu.memory_space<vmem>>, vector<2x32xf32>,
    %c8_72 = arith.constant 8 : index
    %c0_73 = arith.constant 0 : index
    %155 = vector.load %arg12[%c8_72, %c0_73] : memref<16x128xf32, #tpu.memory_space<vmem>>, vector<2x128xf32>
    %156 = arith.truncf %153 : vector<2x32xf32> to vector<2x32xbf16>
    %cst_74 = arith.constant dense<0.000000e+00> : vector<2x128xf32>
    %157 = tpu.matmul %156, %25, %cst_74 {dimension_numbers = #tpu.dot_dimension_numbers<[1], [0], [0], [1], [0, 0, 1, 1], [], []>} : vector<2x32xbf16>, vector<32x128xbf16>, vector<2x128xf32> -> vector<2x128xf32>
    %158 = arith.addf %155, %157 : vector<2x128xf32>
    %159 = vector.extract_strided_slice %158 {offsets = [0, 0], sizes = [2, 32], strides = [1, 1]} : vector<2x128xf32> to vector<2x32xf32>
    %160 = arith.negf %159 : vector<2x32xf32>
    %161 = math.exp %160 : vector<2x32xf32>
    %cst_75 = arith.constant 1.000000e+00 : f32
    %162 = vector.broadcast %cst_75 : f32 to vector<2x32xf32>
    %163 = arith.addf %162, %161 : vector<2x32xf32>
    %164 = arith.divf %162, %163 : vector<2x32xf32>
    %165 = vector.extract_strided_slice %158 {offsets = [0, 32], sizes = [2, 32], strides = [1, 1]} : vector<2x128xf32> to vector<2x32xf32>
    %166 = arith.negf %165 : vector<2x32xf32>
    %167 = math.exp %166 : vector<2x32xf32>
    %cst_76 = arith.constant 1.000000e+00 : f32
    %168 = vector.broadcast %cst_76 : f32 to vector<2x32xf32>
    %169 = arith.addf %168, %167 : vector<2x32xf32>
    %170 = arith.divf %168, %169 : vector<2x32xf32>
    %171 = vector.extract_strided_slice %158 {offsets = [0, 64], sizes = [2, 32], strides = [1, 1]} : vector<2x128xf32> to vector<2x32xf32>
    %172 = math.tanh %171 : vector<2x32xf32>
    %173 = vector.extract_strided_slice %158 {offsets = [0, 96], sizes = [2, 32], strides = [1, 1]} : vector<2x128xf32> to vector<2x32xf32>
    %174 = arith.negf %173 : vector<2x32xf32>
    %175 = math.exp %174 : vector<2x32xf32>
    %cst_77 = arith.constant 1.000000e+00 : f32
    %176 = vector.broadcast %cst_77 : f32 to vector<2x32xf32>
    %177 = arith.addf %176, %175 : vector<2x32xf32>
    %178 = arith.divf %176, %177 : vector<2x32xf32>
    %179 = arith.mulf %170, %151 : vector<2x32xf32>
    %180 = arith.mulf %164, %172 : vector<2x32xf32>
    %181 = arith.addf %179, %180 : vector<2x32xf32>
    %182 = math.tanh %181 : vector<2x32xf32>
    %183 = arith.mulf %178, %182 : vector<2x32xf32>
    %c8_78 = arith.constant 8 : index
    %c0_79 = arith.constant 0 : index
    %184 = vector.load %arg13[%c8_78, %c0_79] : memref<16x32xf32, #tpu.memory_space<vmem>>, vector<2x32xf32>
    tpu.vector_store %arg13[%c8_78, %c0_79], %183 {strides = array<i32>} : memref<16x32xf32, #tpu.memory_space<vmem>>, vector<2x32xf32>,
    %c10_80 = arith.constant 10 : index
    %c0_81 = arith.constant 0 : index
    %185 = vector.load %arg12[%c10_80, %c0_81] : memref<16x128xf32, #tpu.memory_space<vmem>>, vector<2x128xf32>
    %186 = arith.truncf %183 : vector<2x32xf32> to vector<2x32xbf16>
    %cst_82 = arith.constant dense<0.000000e+00> : vector<2x128xf32>
    %187 = tpu.matmul %186, %25, %cst_82 {dimension_numbers = #tpu.dot_dimension_numbers<[1], [0], [0], [1], [0, 0, 1, 1], [], []>} : vector<2x32xbf16>, vector<32x128xbf16>, vector<2x128xf32> -> vector<2x128xf32>
    %188 = arith.addf %185, %187 : vector<2x128xf32>
    %189 = vector.extract_strided_slice %188 {offsets = [0, 0], sizes = [2, 32], strides = [1, 1]} : vector<2x128xf32> to vector<2x32xf32>
    %190 = arith.negf %189 : vector<2x32xf32>
    %191 = math.exp %190 : vector<2x32xf32>
    %cst_83 = arith.constant 1.000000e+00 : f32
    %192 = vector.broadcast %cst_83 : f32 to vector<2x32xf32>
    %193 = arith.addf %192, %191 : vector<2x32xf32>
    %194 = arith.divf %192, %193 : vector<2x32xf32>
    %195 = vector.extract_strided_slice %188 {offsets = [0, 32], sizes = [2, 32], strides = [1, 1]} : vector<2x128xf32> to vector<2x32xf32>
    %196 = arith.negf %195 : vector<2x32xf32>
    %197 = math.exp %196 : vector<2x32xf32>
    %cst_84 = arith.constant 1.000000e+00 : f32
    %198 = vector.broadcast %cst_84 : f32 to vector<2x32xf32>
    %199 = arith.addf %198, %197 : vector<2x32xf32>
    %200 = arith.divf %198, %199 : vector<2x32xf32>
    %201 = vector.extract_strided_slice %188 {offsets = [0, 64], sizes = [2, 32], strides = [1, 1]} : vector<2x128xf32> to vector<2x32xf32>
    %202 = math.tanh %201 : vector<2x32xf32>
    %203 = vector.extract_strided_slice %188 {offsets = [0, 96], sizes = [2, 32], strides = [1, 1]} : vector<2x128xf32> to vector<2x32xf32>
    %204 = arith.negf %203 : vector<2x32xf32>
    %205 = math.exp %204 : vector<2x32xf32>
    %cst_85 = arith.constant 1.000000e+00 : f32
    %206 = vector.broadcast %cst_85 : f32 to vector<2x32xf32>
    %207 = arith.addf %206, %205 : vector<2x32xf32>
    %208 = arith.divf %206, %207 : vector<2x32xf32>
    %209 = arith.mulf %200, %181 : vector<2x32xf32>
    %210 = arith.mulf %194, %202 : vector<2x32xf32>
    %211 = arith.addf %209, %210 : vector<2x32xf32>
    %212 = math.tanh %211 : vector<2x32xf32>
    %213 = arith.mulf %208, %212 : vector<2x32xf32>
    %c10_86 = arith.constant 10 : index
    %c0_87 = arith.constant 0 : index
    %214 = vector.load %arg13[%c10_86, %c0_87] : memref<16x32xf32, #tpu.memory_space<vmem>>, vector<2x32xf32>
    tpu.vector_store %arg13[%c10_86, %c0_87], %213 {strides = array<i32>} : memref<16x32xf32, #tpu.memory_space<vmem>>, vector<2x32xf32>,
    %c12_88 = arith.constant 12 : index
    %c0_89 = arith.constant 0 : index
    %215 = vector.load %arg12[%c12_88, %c0_89] : memref<16x128xf32, #tpu.memory_space<vmem>>, vector<2x128xf32>
    %216 = arith.truncf %213 : vector<2x32xf32> to vector<2x32xbf16>
    %cst_90 = arith.constant dense<0.000000e+00> : vector<2x128xf32>
    %217 = tpu.matmul %216, %25, %cst_90 {dimension_numbers = #tpu.dot_dimension_numbers<[1], [0], [0], [1], [0, 0, 1, 1], [], []>} : vector<2x32xbf16>, vector<32x128xbf16>, vector<2x128xf32> -> vector<2x128xf32>
    %218 = arith.addf %215, %217 : vector<2x128xf32>
    %219 = vector.extract_strided_slice %218 {offsets = [0, 0], sizes = [2, 32], strides = [1, 1]} : vector<2x128xf32> to vector<2x32xf32>
    %220 = arith.negf %219 : vector<2x32xf32>
    %221 = math.exp %220 : vector<2x32xf32>
    %cst_91 = arith.constant 1.000000e+00 : f32
    %222 = vector.broadcast %cst_91 : f32 to vector<2x32xf32>
    %223 = arith.addf %222, %221 : vector<2x32xf32>
    %224 = arith.divf %222, %223 : vector<2x32xf32>
    %225 = vector.extract_strided_slice %218 {offsets = [0, 32], sizes = [2, 32], strides = [1, 1]} : vector<2x128xf32> to vector<2x32xf32>
    %226 = arith.negf %225 : vector<2x32xf32>
    %227 = math.exp %226 : vector<2x32xf32>
    %cst_92 = arith.constant 1.000000e+00 : f32
    %228 = vector.broadcast %cst_92 : f32 to vector<2x32xf32>
    %229 = arith.addf %228, %227 : vector<2x32xf32>
    %230 = arith.divf %228, %229 : vector<2x32xf32>
    %231 = vector.extract_strided_slice %218 {offsets = [0, 64], sizes = [2, 32], strides = [1, 1]} : vector<2x128xf32> to vector<2x32xf32>
    %232 = math.tanh %231 : vector<2x32xf32>
    %233 = vector.extract_strided_slice %218 {offsets = [0, 96], sizes = [2, 32], strides = [1, 1]} : vector<2x128xf32> to vector<2x32xf32>
    %234 = arith.negf %233 : vector<2x32xf32>
    %235 = math.exp %234 : vector<2x32xf32>
    %cst_93 = arith.constant 1.000000e+00 : f32
    %236 = vector.broadcast %cst_93 : f32 to vector<2x32xf32>
    %237 = arith.addf %236, %235 : vector<2x32xf32>
    %238 = arith.divf %236, %237 : vector<2x32xf32>
    %239 = arith.mulf %230, %211 : vector<2x32xf32>
    %240 = arith.mulf %224, %232 : vector<2x32xf32>
    %241 = arith.addf %239, %240 : vector<2x32xf32>
    %242 = math.tanh %241 : vector<2x32xf32>
    %243 = arith.mulf %238, %242 : vector<2x32xf32>
    %c12_94 = arith.constant 12 : index
    %c0_95 = arith.constant 0 : index
    %244 = vector.load %arg13[%c12_94, %c0_95] : memref<16x32xf32, #tpu.memory_space<vmem>>, vector<2x32xf32>
    tpu.vector_store %arg13[%c12_94, %c0_95], %243 {strides = array<i32>} : memref<16x32xf32, #tpu.memory_space<vmem>>, vector<2x32xf32>,
    %c14_96 = arith.constant 14 : index
    %c0_97 = arith.constant 0 : index
    %245 = vector.load %arg12[%c14_96, %c0_97] : memref<16x128xf32, #tpu.memory_space<vmem>>, vector<2x128xf32>
    %246 = arith.truncf %243 : vector<2x32xf32> to vector<2x32xbf16>
    %cst_98 = arith.constant dense<0.000000e+00> : vector<2x128xf32>
    %247 = tpu.matmul %246, %25, %cst_98 {dimension_numbers = #tpu.dot_dimension_numbers<[1], [0], [0], [1], [0, 0, 1, 1], [], []>} : vector<2x32xbf16>, vector<32x128xbf16>, vector<2x128xf32> -> vector<2x128xf32>
    %248 = arith.addf %245, %247 : vector<2x128xf32>
    %249 = vector.extract_strided_slice %248 {offsets = [0, 0], sizes = [2, 32], strides = [1, 1]} : vector<2x128xf32> to vector<2x32xf32>
    %250 = arith.negf %249 : vector<2x32xf32>
    %251 = math.exp %250 : vector<2x32xf32>
    %cst_99 = arith.constant 1.000000e+00 : f32
    %252 = vector.broadcast %cst_99 : f32 to vector<2x32xf32>
    %253 = arith.addf %252, %251 : vector<2x32xf32>
    %254 = arith.divf %252, %253 : vector<2x32xf32>
    %255 = vector.extract_strided_slice %248 {offsets = [0, 32], sizes = [2, 32], strides = [1, 1]} : vector<2x128xf32> to vector<2x32xf32>
    %256 = arith.negf %255 : vector<2x32xf32>
    %257 = math.exp %256 : vector<2x32xf32>
    %cst_100 = arith.constant 1.000000e+00 : f32
    %258 = vector.broadcast %cst_100 : f32 to vector<2x32xf32>
    %259 = arith.addf %258, %257 : vector<2x32xf32>
    %260 = arith.divf %258, %259 : vector<2x32xf32>
    %261 = vector.extract_strided_slice %248 {offsets = [0, 64], sizes = [2, 32], strides = [1, 1]} : vector<2x128xf32> to vector<2x32xf32>
    %262 = math.tanh %261 : vector<2x32xf32>
    %263 = vector.extract_strided_slice %248 {offsets = [0, 96], sizes = [2, 32], strides = [1, 1]} : vector<2x128xf32> to vector<2x32xf32>
    %264 = arith.negf %263 : vector<2x32xf32>
    %265 = math.exp %264 : vector<2x32xf32>
    %cst_101 = arith.constant 1.000000e+00 : f32
    %266 = vector.broadcast %cst_101 : f32 to vector<2x32xf32>
    %267 = arith.addf %266, %265 : vector<2x32xf32>
    %268 = arith.divf %266, %267 : vector<2x32xf32>
    %269 = arith.mulf %260, %241 : vector<2x32xf32>
    %270 = arith.mulf %254, %262 : vector<2x32xf32>
    %271 = arith.addf %269, %270 : vector<2x32xf32>
    %272 = math.tanh %271 : vector<2x32xf32>
    %273 = arith.mulf %268, %272 : vector<2x32xf32>
    %c14_102 = arith.constant 14 : index
    %c0_103 = arith.constant 0 : index
    %274 = vector.load %arg13[%c14_102, %c0_103] : memref<16x32xf32, #tpu.memory_space<vmem>>, vector<2x32xf32>
    tpu.vector_store %arg13[%c14_102, %c0_103], %273 {strides = array<i32>} : memref<16x32xf32, #tpu.memory_space<vmem>>, vector<2x32xf32>,
    %c0_104 = arith.constant 0 : index
    %c0_105 = arith.constant 0 : index
    %275 = vector.load %arg5[%c0_104, %c0_105] : memref<32x128xbf16, #tpu.memory_space<vmem>>, vector<32x128xbf16>
    %c0_106 = arith.constant 0 : index
    %c0_107 = arith.constant 0 : index
    %276 = vector.load %arg6[%c0_106, %c0_107] : memref<32x128xbf16, #tpu.memory_space<vmem>>, vector<32x128xbf16>
    %c0_108 = arith.constant 0 : index
    %c0_109 = arith.constant 0 : index
    %277 = vector.load %arg7[%c0_108, %c0_109] : memref<1x128xf32, #tpu.memory_space<vmem>>, vector<1x128xf32>
    %c0_110 = arith.constant 0 : index
    %c0_111 = arith.constant 0 : index
    %278 = vector.load %arg13[%c0_110, %c0_111] : memref<16x32xf32, #tpu.memory_space<vmem>>, vector<16x32xf32>
    %279 = arith.truncf %278 : vector<16x32xf32> to vector<16x32xbf16>
    %cst_112 = arith.constant dense<0.000000e+00> : vector<16x128xf32>
    %280 = tpu.matmul %279, %275, %cst_112 {dimension_numbers = #tpu.dot_dimension_numbers<[1], [0], [0], [1], [0, 0, 1, 1], [], []>} : vector<16x32xbf16>, vector<32x128xbf16>, vector<16x128xf32> -> vector<16x128xf32>
    %281 = vector.broadcast %277 : vector<1x128xf32> to vector<16x128xf32>
    %282 = arith.addf %280, %281 : vector<16x128xf32>
    %c0_113 = arith.constant 0 : index
    %c0_114 = arith.constant 0 : index
    %283 = vector.load %arg12[%c0_113, %c0_114] : memref<16x128xf32, #tpu.memory_space<vmem>>, vector<16x128xf32>
    tpu.vector_store %arg12[%c0_113, %c0_114], %282 {strides = array<i32>} : memref<16x128xf32, #tpu.memory_space<vmem>>, vector<16x128xf32>,
    %cst_115 = arith.constant 0.000000e+00 : f32
    %284 = vector.broadcast %cst_115 : f32 to vector<2x32xf32>
    %cst_116 = arith.constant 0.000000e+00 : f32
    %285 = vector.broadcast %cst_116 : f32 to vector<2x32xf32>
    %c0_117 = arith.constant 0 : index
    %c0_118 = arith.constant 0 : index
    %286 = vector.load %arg12[%c0_117, %c0_118] : memref<16x128xf32, #tpu.memory_space<vmem>>, vector<2x128xf32>
    %287 = arith.truncf %284 : vector<2x32xf32> to vector<2x32xbf16>
    %cst_119 = arith.constant dense<0.000000e+00> : vector<2x128xf32>
    %288 = tpu.matmul %287, %276, %cst_119 {dimension_numbers = #tpu.dot_dimension_numbers<[1], [0], [0], [1], [0, 0, 1, 1], [], []>} : vector<2x32xbf16>, vector<32x128xbf16>, vector<2x128xf32> -> vector<2x128xf32>
    %289 = arith.addf %286, %288 : vector<2x128xf32>
    %290 = vector.extract_strided_slice %289 {offsets = [0, 0], sizes = [2, 32], strides = [1, 1]} : vector<2x128xf32> to vector<2x32xf32>
    %291 = arith.negf %290 : vector<2x32xf32>
    %292 = math.exp %291 : vector<2x32xf32>
    %cst_120 = arith.constant 1.000000e+00 : f32
    %293 = vector.broadcast %cst_120 : f32 to vector<2x32xf32>
    %294 = arith.addf %293, %292 : vector<2x32xf32>
    %295 = arith.divf %293, %294 : vector<2x32xf32>
    %296 = vector.extract_strided_slice %289 {offsets = [0, 32], sizes = [2, 32], strides = [1, 1]} : vector<2x128xf32> to vector<2x32xf32>
    %297 = arith.negf %296 : vector<2x32xf32>
    %298 = math.exp %297 : vector<2x32xf32>
    %cst_121 = arith.constant 1.000000e+00 : f32
    %299 = vector.broadcast %cst_121 : f32 to vector<2x32xf32>
    %300 = arith.addf %299, %298 : vector<2x32xf32>
    %301 = arith.divf %299, %300 : vector<2x32xf32>
    %302 = vector.extract_strided_slice %289 {offsets = [0, 64], sizes = [2, 32], strides = [1, 1]} : vector<2x128xf32> to vector<2x32xf32>
    %303 = math.tanh %302 : vector<2x32xf32>
    %304 = vector.extract_strided_slice %289 {offsets = [0, 96], sizes = [2, 32], strides = [1, 1]} : vector<2x128xf32> to vector<2x32xf32>
    %305 = arith.negf %304 : vector<2x32xf32>
    %306 = math.exp %305 : vector<2x32xf32>
    %cst_122 = arith.constant 1.000000e+00 : f32
    %307 = vector.broadcast %cst_122 : f32 to vector<2x32xf32>
    %308 = arith.addf %307, %306 : vector<2x32xf32>
    %309 = arith.divf %307, %308 : vector<2x32xf32>
    %310 = arith.mulf %301, %285 : vector<2x32xf32>
    %311 = arith.mulf %295, %303 : vector<2x32xf32>
    %312 = arith.addf %310, %311 : vector<2x32xf32>
    %313 = math.tanh %312 : vector<2x32xf32>
    %314 = arith.mulf %309, %313 : vector<2x32xf32>
    %c2_123 = arith.constant 2 : index
    %c0_124 = arith.constant 0 : index
    %315 = vector.load %arg12[%c2_123, %c0_124] : memref<16x128xf32, #tpu.memory_space<vmem>>, vector<2x128xf32>
    %316 = arith.truncf %314 : vector<2x32xf32> to vector<2x32xbf16>
    %cst_125 = arith.constant dense<0.000000e+00> : vector<2x128xf32>
    %317 = tpu.matmul %316, %276, %cst_125 {dimension_numbers = #tpu.dot_dimension_numbers<[1], [0], [0], [1], [0, 0, 1, 1], [], []>} : vector<2x32xbf16>, vector<32x128xbf16>, vector<2x128xf32> -> vector<2x128xf32>
    %318 = arith.addf %315, %317 : vector<2x128xf32>
    %319 = vector.extract_strided_slice %318 {offsets = [0, 0], sizes = [2, 32], strides = [1, 1]} : vector<2x128xf32> to vector<2x32xf32>
    %320 = arith.negf %319 : vector<2x32xf32>
    %321 = math.exp %320 : vector<2x32xf32>
    %cst_126 = arith.constant 1.000000e+00 : f32
    %322 = vector.broadcast %cst_126 : f32 to vector<2x32xf32>
    %323 = arith.addf %322, %321 : vector<2x32xf32>
    %324 = arith.divf %322, %323 : vector<2x32xf32>
    %325 = vector.extract_strided_slice %318 {offsets = [0, 32], sizes = [2, 32], strides = [1, 1]} : vector<2x128xf32> to vector<2x32xf32>
    %326 = arith.negf %325 : vector<2x32xf32>
    %327 = math.exp %326 : vector<2x32xf32>
    %cst_127 = arith.constant 1.000000e+00 : f32
    %328 = vector.broadcast %cst_127 : f32 to vector<2x32xf32>
    %329 = arith.addf %328, %327 : vector<2x32xf32>
    %330 = arith.divf %328, %329 : vector<2x32xf32>
    %331 = vector.extract_strided_slice %318 {offsets = [0, 64], sizes = [2, 32], strides = [1, 1]} : vector<2x128xf32> to vector<2x32xf32>
    %332 = math.tanh %331 : vector<2x32xf32>
    %333 = vector.extract_strided_slice %318 {offsets = [0, 96], sizes = [2, 32], strides = [1, 1]} : vector<2x128xf32> to vector<2x32xf32>
    %334 = arith.negf %333 : vector<2x32xf32>
    %335 = math.exp %334 : vector<2x32xf32>
    %cst_128 = arith.constant 1.000000e+00 : f32
    %336 = vector.broadcast %cst_128 : f32 to vector<2x32xf32>
    %337 = arith.addf %336, %335 : vector<2x32xf32>
    %338 = arith.divf %336, %337 : vector<2x32xf32>
    %339 = arith.mulf %330, %312 : vector<2x32xf32>
    %340 = arith.mulf %324, %332 : vector<2x32xf32>
    %341 = arith.addf %339, %340 : vector<2x32xf32>
    %342 = math.tanh %341 : vector<2x32xf32>
    %343 = arith.mulf %338, %342 : vector<2x32xf32>
    %c4_129 = arith.constant 4 : index
    %c0_130 = arith.constant 0 : index
    %344 = vector.load %arg12[%c4_129, %c0_130] : memref<16x128xf32, #tpu.memory_space<vmem>>, vector<2x128xf32>
    %345 = arith.truncf %343 : vector<2x32xf32> to vector<2x32xbf16>
    %cst_131 = arith.constant dense<0.000000e+00> : vector<2x128xf32>
    %346 = tpu.matmul %345, %276, %cst_131 {dimension_numbers = #tpu.dot_dimension_numbers<[1], [0], [0], [1], [0, 0, 1, 1], [], []>} : vector<2x32xbf16>, vector<32x128xbf16>, vector<2x128xf32> -> vector<2x128xf32>
    %347 = arith.addf %344, %346 : vector<2x128xf32>
    %348 = vector.extract_strided_slice %347 {offsets = [0, 0], sizes = [2, 32], strides = [1, 1]} : vector<2x128xf32> to vector<2x32xf32>
    %349 = arith.negf %348 : vector<2x32xf32>
    %350 = math.exp %349 : vector<2x32xf32>
    %cst_132 = arith.constant 1.000000e+00 : f32
    %351 = vector.broadcast %cst_132 : f32 to vector<2x32xf32>
    %352 = arith.addf %351, %350 : vector<2x32xf32>
    %353 = arith.divf %351, %352 : vector<2x32xf32>
    %354 = vector.extract_strided_slice %347 {offsets = [0, 32], sizes = [2, 32], strides = [1, 1]} : vector<2x128xf32> to vector<2x32xf32>
    %355 = arith.negf %354 : vector<2x32xf32>
    %356 = math.exp %355 : vector<2x32xf32>
    %cst_133 = arith.constant 1.000000e+00 : f32
    %357 = vector.broadcast %cst_133 : f32 to vector<2x32xf32>
    %358 = arith.addf %357, %356 : vector<2x32xf32>
    %359 = arith.divf %357, %358 : vector<2x32xf32>
    %360 = vector.extract_strided_slice %347 {offsets = [0, 64], sizes = [2, 32], strides = [1, 1]} : vector<2x128xf32> to vector<2x32xf32>
    %361 = math.tanh %360 : vector<2x32xf32>
    %362 = vector.extract_strided_slice %347 {offsets = [0, 96], sizes = [2, 32], strides = [1, 1]} : vector<2x128xf32> to vector<2x32xf32>
    %363 = arith.negf %362 : vector<2x32xf32>
    %364 = math.exp %363 : vector<2x32xf32>
    %cst_134 = arith.constant 1.000000e+00 : f32
    %365 = vector.broadcast %cst_134 : f32 to vector<2x32xf32>
    %366 = arith.addf %365, %364 : vector<2x32xf32>
    %367 = arith.divf %365, %366 : vector<2x32xf32>
    %368 = arith.mulf %359, %341 : vector<2x32xf32>
    %369 = arith.mulf %353, %361 : vector<2x32xf32>
    %370 = arith.addf %368, %369 : vector<2x32xf32>
    %371 = math.tanh %370 : vector<2x32xf32>
    %372 = arith.mulf %367, %371 : vector<2x32xf32>
    %c6_135 = arith.constant 6 : index
    %c0_136 = arith.constant 0 : index
    %373 = vector.load %arg12[%c6_135, %c0_136] : memref<16x128xf32, #tpu.memory_space<vmem>>, vector<2x128xf32>
    %374 = arith.truncf %372 : vector<2x32xf32> to vector<2x32xbf16>
    %cst_137 = arith.constant dense<0.000000e+00> : vector<2x128xf32>
    %375 = tpu.matmul %374, %276, %cst_137 {dimension_numbers = #tpu.dot_dimension_numbers<[1], [0], [0], [1], [0, 0, 1, 1], [], []>} : vector<2x32xbf16>, vector<32x128xbf16>, vector<2x128xf32> -> vector<2x128xf32>
    %376 = arith.addf %373, %375 : vector<2x128xf32>
    %377 = vector.extract_strided_slice %376 {offsets = [0, 0], sizes = [2, 32], strides = [1, 1]} : vector<2x128xf32> to vector<2x32xf32>
    %378 = arith.negf %377 : vector<2x32xf32>
    %379 = math.exp %378 : vector<2x32xf32>
    %cst_138 = arith.constant 1.000000e+00 : f32
    %380 = vector.broadcast %cst_138 : f32 to vector<2x32xf32>
    %381 = arith.addf %380, %379 : vector<2x32xf32>
    %382 = arith.divf %380, %381 : vector<2x32xf32>
    %383 = vector.extract_strided_slice %376 {offsets = [0, 32], sizes = [2, 32], strides = [1, 1]} : vector<2x128xf32> to vector<2x32xf32>
    %384 = arith.negf %383 : vector<2x32xf32>
    %385 = math.exp %384 : vector<2x32xf32>
    %cst_139 = arith.constant 1.000000e+00 : f32
    %386 = vector.broadcast %cst_139 : f32 to vector<2x32xf32>
    %387 = arith.addf %386, %385 : vector<2x32xf32>
    %388 = arith.divf %386, %387 : vector<2x32xf32>
    %389 = vector.extract_strided_slice %376 {offsets = [0, 64], sizes = [2, 32], strides = [1, 1]} : vector<2x128xf32> to vector<2x32xf32>
    %390 = math.tanh %389 : vector<2x32xf32>
    %391 = vector.extract_strided_slice %376 {offsets = [0, 96], sizes = [2, 32], strides = [1, 1]} : vector<2x128xf32> to vector<2x32xf32>
    %392 = arith.negf %391 : vector<2x32xf32>
    %393 = math.exp %392 : vector<2x32xf32>
    %cst_140 = arith.constant 1.000000e+00 : f32
    %394 = vector.broadcast %cst_140 : f32 to vector<2x32xf32>
    %395 = arith.addf %394, %393 : vector<2x32xf32>
    %396 = arith.divf %394, %395 : vector<2x32xf32>
    %397 = arith.mulf %388, %370 : vector<2x32xf32>
    %398 = arith.mulf %382, %390 : vector<2x32xf32>
    %399 = arith.addf %397, %398 : vector<2x32xf32>
    %400 = math.tanh %399 : vector<2x32xf32>
    %401 = arith.mulf %396, %400 : vector<2x32xf32>
    %c8_141 = arith.constant 8 : index
    %c0_142 = arith.constant 0 : index
    %402 = vector.load %arg12[%c8_141, %c0_142] : memref<16x128xf32, #tpu.memory_space<vmem>>, vector<2x128xf32>
    %403 = arith.truncf %401 : vector<2x32xf32> to vector<2x32xbf16>
    %cst_143 = arith.constant dense<0.000000e+00> : vector<2x128xf32>
    %404 = tpu.matmul %403, %276, %cst_143 {dimension_numbers = #tpu.dot_dimension_numbers<[1], [0], [0], [1], [0, 0, 1, 1], [], []>} : vector<2x32xbf16>, vector<32x128xbf16>, vector<2x128xf32> -> vector<2x128xf32>
    %405 = arith.addf %402, %404 : vector<2x128xf32>
    %406 = vector.extract_strided_slice %405 {offsets = [0, 0], sizes = [2, 32], strides = [1, 1]} : vector<2x128xf32> to vector<2x32xf32>
    %407 = arith.negf %406 : vector<2x32xf32>
    %408 = math.exp %407 : vector<2x32xf32>
    %cst_144 = arith.constant 1.000000e+00 : f32
    %409 = vector.broadcast %cst_144 : f32 to vector<2x32xf32>
    %410 = arith.addf %409, %408 : vector<2x32xf32>
    %411 = arith.divf %409, %410 : vector<2x32xf32>
    %412 = vector.extract_strided_slice %405 {offsets = [0, 32], sizes = [2, 32], strides = [1, 1]} : vector<2x128xf32> to vector<2x32xf32>
    %413 = arith.negf %412 : vector<2x32xf32>
    %414 = math.exp %413 : vector<2x32xf32>
    %cst_145 = arith.constant 1.000000e+00 : f32
    %415 = vector.broadcast %cst_145 : f32 to vector<2x32xf32>
    %416 = arith.addf %415, %414 : vector<2x32xf32>
    %417 = arith.divf %415, %416 : vector<2x32xf32>
    %418 = vector.extract_strided_slice %405 {offsets = [0, 64], sizes = [2, 32], strides = [1, 1]} : vector<2x128xf32> to vector<2x32xf32>
    %419 = math.tanh %418 : vector<2x32xf32>
    %420 = vector.extract_strided_slice %405 {offsets = [0, 96], sizes = [2, 32], strides = [1, 1]} : vector<2x128xf32> to vector<2x32xf32>
    %421 = arith.negf %420 : vector<2x32xf32>
    %422 = math.exp %421 : vector<2x32xf32>
    %cst_146 = arith.constant 1.000000e+00 : f32
    %423 = vector.broadcast %cst_146 : f32 to vector<2x32xf32>
    %424 = arith.addf %423, %422 : vector<2x32xf32>
    %425 = arith.divf %423, %424 : vector<2x32xf32>
    %426 = arith.mulf %417, %399 : vector<2x32xf32>
    %427 = arith.mulf %411, %419 : vector<2x32xf32>
    %428 = arith.addf %426, %427 : vector<2x32xf32>
    %429 = math.tanh %428 : vector<2x32xf32>
    %430 = arith.mulf %425, %429 : vector<2x32xf32>
    %c10_147 = arith.constant 10 : index
    %c0_148 = arith.constant 0 : index
    %431 = vector.load %arg12[%c10_147, %c0_148] : memref<16x128xf32, #tpu.memory_space<vmem>>, vector<2x128xf32>
    %432 = arith.truncf %430 : vector<2x32xf32> to vector<2x32xbf16>
    %cst_149 = arith.constant dense<0.000000e+00> : vector<2x128xf32>
    %433 = tpu.matmul %432, %276, %cst_149 {dimension_numbers = #tpu.dot_dimension_numbers<[1], [0], [0], [1], [0, 0, 1, 1], [], []>} : vector<2x32xbf16>, vector<32x128xbf16>, vector<2x128xf32> -> vector<2x128xf32>
    %434 = arith.addf %431, %433 : vector<2x128xf32>
    %435 = vector.extract_strided_slice %434 {offsets = [0, 0], sizes = [2, 32], strides = [1, 1]} : vector<2x128xf32> to vector<2x32xf32>
    %436 = arith.negf %435 : vector<2x32xf32>
    %437 = math.exp %436 : vector<2x32xf32>
    %cst_150 = arith.constant 1.000000e+00 : f32
    %438 = vector.broadcast %cst_150 : f32 to vector<2x32xf32>
    %439 = arith.addf %438, %437 : vector<2x32xf32>
    %440 = arith.divf %438, %439 : vector<2x32xf32>
    %441 = vector.extract_strided_slice %434 {offsets = [0, 32], sizes = [2, 32], strides = [1, 1]} : vector<2x128xf32> to vector<2x32xf32>
    %442 = arith.negf %441 : vector<2x32xf32>
    %443 = math.exp %442 : vector<2x32xf32>
    %cst_151 = arith.constant 1.000000e+00 : f32
    %444 = vector.broadcast %cst_151 : f32 to vector<2x32xf32>
    %445 = arith.addf %444, %443 : vector<2x32xf32>
    %446 = arith.divf %444, %445 : vector<2x32xf32>
    %447 = vector.extract_strided_slice %434 {offsets = [0, 64], sizes = [2, 32], strides = [1, 1]} : vector<2x128xf32> to vector<2x32xf32>
    %448 = math.tanh %447 : vector<2x32xf32>
    %449 = vector.extract_strided_slice %434 {offsets = [0, 96], sizes = [2, 32], strides = [1, 1]} : vector<2x128xf32> to vector<2x32xf32>
    %450 = arith.negf %449 : vector<2x32xf32>
    %451 = math.exp %450 : vector<2x32xf32>
    %cst_152 = arith.constant 1.000000e+00 : f32
    %452 = vector.broadcast %cst_152 : f32 to vector<2x32xf32>
    %453 = arith.addf %452, %451 : vector<2x32xf32>
    %454 = arith.divf %452, %453 : vector<2x32xf32>
    %455 = arith.mulf %446, %428 : vector<2x32xf32>
    %456 = arith.mulf %440, %448 : vector<2x32xf32>
    %457 = arith.addf %455, %456 : vector<2x32xf32>
    %458 = math.tanh %457 : vector<2x32xf32>
    %459 = arith.mulf %454, %458 : vector<2x32xf32>
    %c12_153 = arith.constant 12 : index
    %c0_154 = arith.constant 0 : index
    %460 = vector.load %arg12[%c12_153, %c0_154] : memref<16x128xf32, #tpu.memory_space<vmem>>, vector<2x128xf32>
    %461 = arith.truncf %459 : vector<2x32xf32> to vector<2x32xbf16>
    %cst_155 = arith.constant dense<0.000000e+00> : vector<2x128xf32>
    %462 = tpu.matmul %461, %276, %cst_155 {dimension_numbers = #tpu.dot_dimension_numbers<[1], [0], [0], [1], [0, 0, 1, 1], [], []>} : vector<2x32xbf16>, vector<32x128xbf16>, vector<2x128xf32> -> vector<2x128xf32>
    %463 = arith.addf %460, %462 : vector<2x128xf32>
    %464 = vector.extract_strided_slice %463 {offsets = [0, 0], sizes = [2, 32], strides = [1, 1]} : vector<2x128xf32> to vector<2x32xf32>
    %465 = arith.negf %464 : vector<2x32xf32>
    %466 = math.exp %465 : vector<2x32xf32>
    %cst_156 = arith.constant 1.000000e+00 : f32
    %467 = vector.broadcast %cst_156 : f32 to vector<2x32xf32>
    %468 = arith.addf %467, %466 : vector<2x32xf32>
    %469 = arith.divf %467, %468 : vector<2x32xf32>
    %470 = vector.extract_strided_slice %463 {offsets = [0, 32], sizes = [2, 32], strides = [1, 1]} : vector<2x128xf32> to vector<2x32xf32>
    %471 = arith.negf %470 : vector<2x32xf32>
    %472 = math.exp %471 : vector<2x32xf32>
    %cst_157 = arith.constant 1.000000e+00 : f32
    %473 = vector.broadcast %cst_157 : f32 to vector<2x32xf32>
    %474 = arith.addf %473, %472 : vector<2x32xf32>
    %475 = arith.divf %473, %474 : vector<2x32xf32>
    %476 = vector.extract_strided_slice %463 {offsets = [0, 64], sizes = [2, 32], strides = [1, 1]} : vector<2x128xf32> to vector<2x32xf32>
    %477 = math.tanh %476 : vector<2x32xf32>
    %478 = vector.extract_strided_slice %463 {offsets = [0, 96], sizes = [2, 32], strides = [1, 1]} : vector<2x128xf32> to vector<2x32xf32>
    %479 = arith.negf %478 : vector<2x32xf32>
    %480 = math.exp %479 : vector<2x32xf32>
    %cst_158 = arith.constant 1.000000e+00 : f32
    %481 = vector.broadcast %cst_158 : f32 to vector<2x32xf32>
    %482 = arith.addf %481, %480 : vector<2x32xf32>
    %483 = arith.divf %481, %482 : vector<2x32xf32>
    %484 = arith.mulf %475, %457 : vector<2x32xf32>
    %485 = arith.mulf %469, %477 : vector<2x32xf32>
    %486 = arith.addf %484, %485 : vector<2x32xf32>
    %487 = math.tanh %486 : vector<2x32xf32>
    %488 = arith.mulf %483, %487 : vector<2x32xf32>
    %c14_159 = arith.constant 14 : index
    %c0_160 = arith.constant 0 : index
    %489 = vector.load %arg12[%c14_159, %c0_160] : memref<16x128xf32, #tpu.memory_space<vmem>>, vector<2x128xf32>
    %490 = arith.truncf %488 : vector<2x32xf32> to vector<2x32xbf16>
    %cst_161 = arith.constant dense<0.000000e+00> : vector<2x128xf32>
    %491 = tpu.matmul %490, %276, %cst_161 {dimension_numbers = #tpu.dot_dimension_numbers<[1], [0], [0], [1], [0, 0, 1, 1], [], []>} : vector<2x32xbf16>, vector<32x128xbf16>, vector<2x128xf32> -> vector<2x128xf32>
    %492 = arith.addf %489, %491 : vector<2x128xf32>
    %493 = vector.extract_strided_slice %492 {offsets = [0, 0], sizes = [2, 32], strides = [1, 1]} : vector<2x128xf32> to vector<2x32xf32>
    %494 = arith.negf %493 : vector<2x32xf32>
    %495 = math.exp %494 : vector<2x32xf32>
    %cst_162 = arith.constant 1.000000e+00 : f32
    %496 = vector.broadcast %cst_162 : f32 to vector<2x32xf32>
    %497 = arith.addf %496, %495 : vector<2x32xf32>
    %498 = arith.divf %496, %497 : vector<2x32xf32>
    %499 = vector.extract_strided_slice %492 {offsets = [0, 32], sizes = [2, 32], strides = [1, 1]} : vector<2x128xf32> to vector<2x32xf32>
    %500 = arith.negf %499 : vector<2x32xf32>
    %501 = math.exp %500 : vector<2x32xf32>
    %cst_163 = arith.constant 1.000000e+00 : f32
    %502 = vector.broadcast %cst_163 : f32 to vector<2x32xf32>
    %503 = arith.addf %502, %501 : vector<2x32xf32>
    %504 = arith.divf %502, %503 : vector<2x32xf32>
    %505 = vector.extract_strided_slice %492 {offsets = [0, 64], sizes = [2, 32], strides = [1, 1]} : vector<2x128xf32> to vector<2x32xf32>
    %506 = math.tanh %505 : vector<2x32xf32>
    %507 = vector.extract_strided_slice %492 {offsets = [0, 96], sizes = [2, 32], strides = [1, 1]} : vector<2x128xf32> to vector<2x32xf32>
    %508 = arith.negf %507 : vector<2x32xf32>
    %509 = math.exp %508 : vector<2x32xf32>
    %cst_164 = arith.constant 1.000000e+00 : f32
    %510 = vector.broadcast %cst_164 : f32 to vector<2x32xf32>
    %511 = arith.addf %510, %509 : vector<2x32xf32>
    %512 = arith.divf %510, %511 : vector<2x32xf32>
    %513 = arith.mulf %504, %486 : vector<2x32xf32>
    %514 = arith.mulf %498, %506 : vector<2x32xf32>
    %515 = arith.addf %513, %514 : vector<2x32xf32>
    %516 = math.tanh %515 : vector<2x32xf32>
    %517 = arith.mulf %512, %516 : vector<2x32xf32>
    %518 = arith.truncf %517 : vector<2x32xf32> to vector<2x32xbf16>
    %c0_165 = arith.constant 0 : index
    %c0_166 = arith.constant 0 : index
    %519 = vector.load %arg8[%c0_165, %c0_166] : memref<32x128xbf16, #tpu.memory_space<vmem>>, vector<32x128xbf16>
    %cst_167 = arith.constant dense<0.000000e+00> : vector<2x128xf32>
    %520 = tpu.matmul %518, %519, %cst_167 {dimension_numbers = #tpu.dot_dimension_numbers<[1], [0], [0], [1], [0, 0, 1, 1], [], []>} : vector<2x32xbf16>, vector<32x128xbf16>, vector<2x128xf32> -> vector<2x128xf32>
    %c0_168 = arith.constant 0 : index
    %c0_169 = arith.constant 0 : index
    %521 = vector.load %arg9[%c0_168, %c0_169] : memref<1x128xf32, #tpu.memory_space<vmem>>, vector<1x128xf32>
    %522 = vector.broadcast %521 : vector<1x128xf32> to vector<2x128xf32>
    %523 = arith.addf %520, %522 : vector<2x128xf32>
    %c0_170 = arith.constant 0 : index
    %c0_171 = arith.constant 0 : index
    %524 = vector.load %arg10[%c0_170, %c0_171] : memref<2x128xf32, #tpu.memory_space<vmem>>, vector<2x128xf32>
    tpu.vector_store %arg10[%c0_170, %c0_171], %523 {strides = array<i32>} : memref<2x128xf32, #tpu.memory_space<vmem>>, vector<2x128xf32>,
    return
  }
  func.func @transform_0(%arg0: i32) -> (i32, i32, i32) {
    %c0_i32 = arith.constant 0 : i32
    %c0_i32_0 = arith.constant 0 : i32
    %c0_i32_1 = arith.constant 0 : i32
    return %c0_i32, %arg0, %c0_i32_0 : i32, i32, i32
  }
  func.func @transform_1(%arg0: i32) -> (i32, i32) {
    %c0_i32 = arith.constant 0 : i32
    %c0_i32_0 = arith.constant 0 : i32
    %c0_i32_1 = arith.constant 0 : i32
    return %c0_i32, %c0_i32_0 : i32, i32
  }
  func.func @transform_2(%arg0: i32) -> (i32, i32) {
    %c0_i32 = arith.constant 0 : i32
    %c0_i32_0 = arith.constant 0 : i32
    %c0_i32_1 = arith.constant 0 : i32
    return %c0_i32, %c0_i32_0 : i32, i32
  }
  func.func @transform_3(%arg0: i32) -> (i32, i32) {
    %c0_i32 = arith.constant 0 : i32
    %c0_i32_0 = arith.constant 0 : i32
    %c0_i32_1 = arith.constant 0 : i32
    return %c0_i32, %c0_i32_0 : i32, i32
  }
  func.func @transform_4(%arg0: i32) -> (i32, i32) {
    %c0_i32 = arith.constant 0 : i32
    %c0_i32_0 = arith.constant 0 : i32
    %c0_i32_1 = arith.constant 0 : i32
    return %c0_i32, %c0_i32_0 : i32, i32
  }
  func.func @transform_5(%arg0: i32) -> (i32, i32) {
    %c0_i32 = arith.constant 0 : i32
    %c0_i32_0 = arith.constant 0 : i32
    %c0_i32_1 = arith.constant 0 : i32
    return %c0_i32, %c0_i32_0 : i32, i32
  }
  func.func @transform_6(%arg0: i32) -> (i32, i32) {
    %c0_i32 = arith.constant 0 : i32
    %c0_i32_0 = arith.constant 0 : i32
    %c0_i32_1 = arith.constant 0 : i32
    return %c0_i32, %c0_i32_0 : i32, i32
  }
  func.func @transform_7(%arg0: i32) -> (i32, i32) {
    %c0_i32 = arith.constant 0 : i32
    %c0_i32_0 = arith.constant 0 : i32
    %c0_i32_1 = arith.constant 0 : i32
    return %c0_i32, %c0_i32_0 : i32, i32
  }
  func.func @transform_8(%arg0: i32) -> (i32, i32) {
    %c0_i32 = arith.constant 0 : i32
    %c0_i32_0 = arith.constant 0 : i32
    %c0_i32_1 = arith.constant 0 : i32
    return %c0_i32, %c0_i32_0 : i32, i32
  }
  func.func @transform_9(%arg0: i32) -> (i32, i32) {
    %c0_i32 = arith.constant 0 : i32
    %c0_i32_0 = arith.constant 0 : i32
    return %arg0, %c0_i32 : i32, i32
  }
}

</mosaic_0001>

<bundles_post_ra>
// kernel: tpu_custom_call.1
= control target key start
LH: loop header
LB: loop body
LE: loop exit
PB: predicated region body
PF: predicated region fallthrough
CT: control target
= control target key end

     0   :  { %14 = vsyncpa [#allocation6], 0  ;;  %s2537_s0 = inlined_call_operand.hbm [shape: f32[8,2,16], index: 0, kind: input, shape index: {}]   ;;  %s2538_s1 = inlined_call_operand.hbm [shape: bf16[16,128], index: 1, kind: input, shape index: {}]   ;;  %s2539_s2 = inlined_call_operand.hbm [shape: bf16[32,128], index: 2, kind: input, shape index: {}]   ;;  %s2540_s3 = inlined_call_operand.vmem [shape: f32[1,128], index: 3, kind: input, shape index: {}]   ;;  %s2541_s4 = inlined_call_operand.hbm [shape: bf16[32,128], index: 4, kind: input, shape index: {}]   ;;  %s2542_s5 = inlined_call_operand.vmem [shape: bf16[32,128], index: 5, kind: input, shape index: {}]   ;;  %s2543_s6 = inlined_call_operand.vmem [shape: f32[1,128], index: 6, kind: input, shape index: {}]   ;;  %s2544_s7 = inlined_call_operand.hbm [shape: bf16[32,128], index: 7, kind: input, shape index: {}]   ;;  %s2545_s8 = inlined_call_operand.vmem [shape: f32[1,128], index: 8, kind: input, shape index: {}]   ;;  %s2546_s9 = inlined_call_operand.hbm [shape: f32[2,128], index: 9, kind: output, shape index: {}]  }
   0x1   :  { %15 = vsyncpa [#allocation9], 0 }
   0x2   :  { %16 = vsyncpa [#allocation12], 0 }
   0x3   :  { %17 = vsyncpa [#allocation7], 0  ;;  %s2123_s30 = smov [#allocation8]   ;;  %s1983_s13 = scalar_lea.hbm %s2538_s1, 128 }
   0x4   :  { %s35_s10 = sshll.u32 %s2123_s30, 4  ;;  %p1984_p0 = scmp.ne.s32.totalorder %s2538_s1, %s1983_s13  ;;  %s36_s10 = int_to_ptr.vmem [resolvable:$true] %s35_s10 }
   0x5   :  { %p1987_p1 = scmp.lt.u32.totalorder %s1983_s13, %s2538_s1 }
   0x7   :  { %p1989_p2 = pnand %p1987_p1, %p1984_p0 }
   0x9   :  { %1992 = shalt.err (!%p1989_p2)
}
   0xa   :  { %s1993_s18 = scalar_lea.vmem %s36_s10, 128  ;;  %p1998_p4 = scmp.lt.s32.totalorder %s36_s10, %s36_s10 }
   0xb   :  { %p1994_p3 = scmp.ne.s32.totalorder %s36_s10, %s1993_s18  ;;  %p1999_p5 = scmp.lt.s32.totalorder %s1993_s18, %s1993_s18 }
   0xd   :  { %p2000_p6 = por %p1999_p5, %p1998_p4 }
   0xf   :  { %p2001_p7 = pnand %p2000_p6, %p1994_p3 }
  0x11   :  { %2004 = shalt.err (!%p2001_p7)
}
  0x12   :  { %s2124_s19 = smov 64   ;;  %s2125_s20 = smov 4  }
  0x13   :  { %41 = dma.hbm_to_vmem [thread:$0]  %s2538_s1, 128, %s36_s10, [#allocation9], %s2124_s19, %s2124_s19, %s2125_s20  }
  0x14   :  { %s2126_s23 = smov [#allocation11]   ;;  %s2127_s25 = smov [#allocation5]  }
  0x15   :  { %s61_s24 = sshll.u32 %s2126_s23, 4  ;;  %s23_s26 = sshll.u32 %s2127_s25, 4  ;;  %s62_s24 = int_to_ptr.vmem [resolvable:$true] %s61_s24  ;;  %s24_s26 = int_to_ptr.vmem [resolvable:$true] %s23_s26 }
  0x16   :  { %s2005_s29 = scalar_lea.hbm %s2541_s4, 256 }
  0x17   :  { %p2006_p8 = scmp.ne.s32.totalorder %s2541_s4, %s2005_s29  ;;  %p2009_p9 = scmp.lt.u32.totalorder %s2005_s29, %s2541_s4 }
  0x19   :  { %p2011_p10 = pnand %p2009_p9, %p2006_p8 }
  0x1b   :  { %2014 = shalt.err (!%p2011_p10)
}
  0x1c   :  { %s2015_s1 = scalar_lea.vmem %s62_s24, 256  ;;  %p2020_p12 = scmp.lt.s32.totalorder %s62_s24, %s62_s24 }
  0x1d   :  { %p2016_p11 = scmp.ne.s32.totalorder %s62_s24, %s2015_s1  ;;  %p2021_p13 = scmp.lt.s32.totalorder %s2015_s1, %s2015_s1 }
  0x1f   :  { %p2022_p0 = por %p2021_p13, %p2020_p12 }
  0x21   :  { %p2023_p1 = pnand %p2022_p0, %p2016_p11 }
  0x23   :  { %2026 = shalt.err (!%p2023_p1)
}
  0x24   :  { %67 = dma.hbm_to_vmem [thread:$0]  %s2541_s4, 256, %s62_s24, [#allocation12], %s2124_s19, %s2124_s19, %s2125_s20  }
  0x25   :  { %s2027_s17 = scalar_lea.hbm %s2537_s0, 256 }
  0x26   :  { %p2028_p2 = scmp.ne.s32.totalorder %s2537_s0, %s2027_s17  ;;  %p2031_p3 = scmp.lt.u32.totalorder %s2027_s17, %s2537_s0 }
  0x28   :  { %p2033_p4 = pnand %p2031_p3, %p2028_p2 }
  0x2a   :  { %2036 = shalt.err (!%p2033_p4)
}
  0x2b   :  { %s2037_s25 = scalar_lea.vmem %s24_s26, 256  ;;  %p2042_p6 = scmp.lt.s32.totalorder %s24_s26, %s24_s26 }
  0x2c   :  { %p2038_p5 = scmp.ne.s32.totalorder %s24_s26, %s2037_s25  ;;  %p2043_p7 = scmp.lt.s32.totalorder %s2037_s25, %s2037_s25 }
  0x2e   :  { %p2044_p8 = por %p2043_p7, %p2042_p6 }
  0x30   :  { %p2045_p9 = pnand %p2044_p8, %p2038_p5 }
  0x32   :  { %2048 = shalt.err (!%p2045_p9)
}
  0x33   :  { %s2128_s4 = smov 32   ;;  %s2129_s24 = smov 2  }
  0x34   :  { %29 = dma.hbm_to_vmem [thread:$0]  %s2537_s0, 256, %s24_s26, [#allocation6], %s2128_s4, %s2128_s4, %s2129_s24  }
  0x35   :  { %s2130_s29 = smov [#allocation10]   ;;  %s2131_s11 = smov [#allocation13]  }
  0x36   :  { %s47_s30 = sshll.u32 %s2130_s29, 4  ;;  %s77_s12 = sshll.u32 %s2131_s11, 4  ;;  %s48_s30 = int_to_ptr.vmem [resolvable:$true] %s47_s30  ;;  %s78_s12 = int_to_ptr.vmem [resolvable:$true] %s77_s12 }
  0x37   :  { %s2049_s10 = scalar_lea.hbm %s2539_s2, 256 }
  0x38   :  { %p2050_p10 = scmp.ne.s32.totalorder %s2539_s2, %s2049_s10  ;;  %p2053_p11 = scmp.lt.u32.totalorder %s2049_s10, %s2539_s2 }
  0x3a   :  { %p2055_p12 = pnand %p2053_p11, %p2050_p10 }
  0x3c   :  { %2058 = shalt.err (!%p2055_p12)
}
  0x3d   :  { %s2059_s0 = scalar_lea.vmem %s48_s30, 256  ;;  %p2064_p0 = scmp.lt.s32.totalorder %s48_s30, %s48_s30 }
  0x3e   :  { %p2060_p13 = scmp.ne.s32.totalorder %s48_s30, %s2059_s0  ;;  %p2065_p1 = scmp.lt.s32.totalorder %s2059_s0, %s2059_s0 }
  0x40   :  { %p2066_p2 = por %p2065_p1, %p2064_p0 }
  0x42   :  { %p2067_p3 = pnand %p2066_p2, %p2060_p13 }
  0x44   :  { %2070 = shalt.err (!%p2067_p3)
}
  0x45   :  { %53 = dma.hbm_to_vmem [thread:$0]  %s2539_s2, 256, %s48_s30, [#allocation9], %s2124_s19, %s2124_s19, %s2125_s20  }
  0x46   :  { %s2071_s23 = scalar_lea.hbm %s2544_s7, 256 }
  0x47   :  { %p2072_p4 = scmp.ne.s32.totalorder %s2544_s7, %s2071_s23  ;;  %p2075_p5 = scmp.lt.u32.totalorder %s2071_s23, %s2544_s7 }
  0x49   :  { %p2077_p6 = pnand %p2075_p5, %p2072_p4 }
  0x4b   :  { %2080 = shalt.err (!%p2077_p6)
}
  0x4c   :  { %s2081_s29 = scalar_lea.vmem %s78_s12, 256  ;;  %p2086_p8 = scmp.lt.s32.totalorder %s78_s12, %s78_s12 }
  0x4d   :  { %p2082_p7 = scmp.ne.s32.totalorder %s78_s12, %s2081_s29  ;;  %p2087_p9 = scmp.lt.s32.totalorder %s2081_s29, %s2081_s29 }
  0x4f   :  { %p2088_p10 = por %p2087_p9, %p2086_p8 }
  0x51   :  { %p2089_p11 = pnand %p2088_p10, %p2082_p7 }
  0x53   :  { %2092 = shalt.err (!%p2089_p11)
}
  0x54   :  { %83 = dma.hbm_to_vmem [thread:$0]  %s2544_s7, 256, %s78_s12, [#allocation12], %s2124_s19, %s2124_s19, %s2125_s20  }
  0x55   :  { %2115 = dma.done.wait [#allocation6], 256  }
  0x56   :  { %2116 = vsyncadd [#allocation6], 4294967040 }
  0x57   :  { %2117 = dma.done.wait [#allocation9], 384  }
  0x58   :  { %2118 = vsyncadd [#allocation9], 4294966912 }
  0x59   :  { %2119 = dma.done.wait [#allocation12], 512  }
  0x5a   :  { %2120 = vsyncadd [#allocation12], 4294966784  ;;  %v2132_v0 = vmov 0.0   ;;  %vm2133_vm0 = vmmov 0   ;;  %vm103_vm1 = vcmask 123904   ;;  %v1846_v1 = vld [vmem:[#allocation8] sm:$0xff]  }
  0x5b   :  { %1683 = vmatprep.subr.bf16.mxu0 %v2132_v0  ;;  %1685 = vmatprep.mubr.msk.bf16.mxu0 %vm2133_vm0, %v2132_v0  ;;  %v102_v2 = vld [vmem:[#allocation5] sm:$0x3]  ;;  %v106_v3 = vld [vmem:[#allocation5 + $0x2] sm:$0x3]  ;;  %v109_v4 = vld [vmem:[#allocation5 + $0x4] sm:$0x3] }
  0x5c   :  { %1689 = vmatprep.subr.bf16.mxu1 %v2132_v0  ;;  %1693 = vmatprep.mubr.msk.bf16.mxu1 %vm2133_vm0, %v2132_v0  ;;  %104 = vst.msk [vmem:[#allocation2] sm:$0x3] %vm103_vm1, %v102_v2  ;;  %107 = vst.msk [vmem:[#allocation2 + $0x2] sm:$0x3] %vm103_vm1, %v106_v3  ;;  %v112_v5 = vld [vmem:[#allocation5 + $0x6] sm:$0x3] }
  0x5d   :  { %1684 = vmatpush3.bf16.msra.mxu0 %v1846_v1  ;;  %110 = vst.msk [vmem:[#allocation2 + $0x4] sm:$0x3] %vm103_vm1, %v109_v4  ;;  %v115_v6 = vld [vmem:[#allocation5 + $0x8] sm:$0x3]  ;;  %v118_v7 = vld [vmem:[#allocation5 + $0xa] sm:$0x3] }
  0x5e   :  { %113 = vst.msk [vmem:[#allocation2 + $0x6] sm:$0x3] %vm103_vm1, %v112_v5  ;;  %116 = vst.msk [vmem:[#allocation2 + $0x8] sm:$0x3] %vm103_vm1, %v115_v6  ;;  %v121_v8 = vld [vmem:[#allocation5 + $0xc] sm:$0x3]  ;;  %1697 = vmatprep.subr.bf16.mxu0 %v2132_v0 }
  0x5f   :  { %119 = vst.msk [vmem:[#allocation2 + $0xa] sm:$0x3] %vm103_vm1, %v118_v7  ;;  %v124_v9 = vld [vmem:[#allocation5 + $0xe] sm:$0x3]  ;;  %122 = vst.msk [vmem:[#allocation2 + $0xc] sm:$0x3] %vm103_vm1, %v121_v8 }
  0x60   :  { %125 = vst.msk [vmem:[#allocation2 + $0xe] sm:$0x3] %vm103_vm1, %v124_v9  ;;  %v2275_v10 = vld [vmem:[#allocation10] sm:$0xff]   ;;  %v2277_v11 = vld [vmem:[#allocation10 + $0x8] sm:$0xff]   ;;  %vm148_vm2 = vcmask 130048   ;;  %v2134_v15 = vmov 0  }
  0x61   :  { %1690 = vmatpush3.bf16.msra.mxu1 %v2275_v10  ;;  %v1582_v16 = vld [vmem:[%s2540_s3] ss:$0 sm:$0xff]  ;;  %vm208_vm3 = vcmask 261120   ;;  %vm281_vm4 = vcmask 254976   ;;  %s2135_s14 = smov [#allocation14]  }
  0x62   :  { %1691 = vmatprep.subr.bf16.mxu1 %v2132_v0  ;;  %s1571_s15 = sshll.u32 %s2135_s14, 4  ;;  %s1572_s15 = int_to_ptr.vmem [resolvable:$true] %s1571_s15 }
  0x63   :  { %p2098_p13 = scmp.lt.s32.totalorder %s1572_s15, %s1572_s15 }
  0x65   :  { %v133_v12 = vld [vmem:[#allocation2] sm:$0xff]  ;;  %1692 = vmatpush3.bf16.msra.mxu1 %v2277_v11 }
  0x66   :  { %1705 = vmatprep.subr.bf16.mxu1 %v2132_v0 }
  0x67   :  { %v134_v13 = vld [vmem:[#allocation2 + $0x8] sm:$0xff] }
  0x68   :  { %v135_v14 = vpack.c.bf16 %v134_v13, %v133_v12  ;;  %1694 = vmatmul.mubr.bf16.vlgmr.msra.gmra.mrb[0].mxu1 %v2134_v15 }
  0x69   :  { %1706 = vmatpush3.bf16.msra.mxu1 %v2275_v10  ;;  %1709 = vmatprep.mubr.msk.bf16.mxu1 %vm2133_vm0, %v2132_v0 }
  0x6a   :  { %1686 = vmatmul.mubr.msk.bf16.vlgmr.msra.gmra.mrb[0].mxu0 %vm148_vm2, %v135_v14  ;;  %1707 = vmatprep.subr.bf16.mxu1 %v2132_v0 }
  0x6b   :  { %1698 = vmatpush3.bf16.msra.mxu0 %v2275_v10  ;;  %1701 = vmatprep.mubr.msk.bf16.mxu0 %vm2133_vm0, %v2132_v0 }
  0x6c   :  { %1699 = vmatprep.subr.bf16.mxu0 %v2132_v0 }
  0x6d   :  { %1708 = vmatpush3.bf16.msra.mxu1 %v2277_v11 }
  0x6e   :  { %1721 = vmatprep.subr.bf16.mxu1 %v2132_v0 }
  0x6f   :  { %1700 = vmatpush3.bf16.msra.mxu0 %v2277_v11 }
  0x70   :  { %1713 = vmatprep.subr.bf16.mxu0 %v2132_v0 }
 0x13b   :  { %v246_v17 = vpop.f32.mrb[0].mxu1 }
 0x13c   :  { %v1695_v19 = vpop.f32.mrb[1].mxu1 }
 0x13d   :  { %v186_v18 = vpop.f32.mrb[0].mxu0  ;;  %v249_v22 = vpop.f32.mrb[2].mxu1 }
 0x13e   :  { %v187_v20 = vadd.f32 %v1582_v16, %v186_v18  ;;  %v1687_v21 = vpop.f32.mrb[1].mxu0  ;;  %v1696_v24 = vpop.f32.mrb[3].mxu1 }
 0x13f   :  { %v189_v23 = vpop.f32.mrb[2].mxu0 }
 0x140   :  { %193 = vst [vmem:[#allocation3] sm:$0xff] %v187_v20  ;;  %v190_v25 = vadd.f32 %v1582_v16, %v189_v23  ;;  %v1688_v26 = vpop.f32.mrb[3].mxu0 }
 0x142   :  { %194 = vst [vmem:[#allocation3 + $0x8] sm:$0xff] %v190_v25 }
 0x147   :  { %v195_v27 = vld [vmem:[#allocation3] sm:$0x3]  ;;  %v283_v44 = vld [vmem:[#allocation3 + $0x2] sm:$0x3]  ;;  %v361_v2 = vld [vmem:[#allocation3 + $0x4] sm:$0x3] }
 0x148   :  { %v252_v28 = vadd.f32 %v246_v17, %v195_v27  ;;  %v439_v26 = vld [vmem:[#allocation3 + $0x6] sm:$0x3] }
 0x14a   :  { %1855 = vtanh.f32 %v252_v28  ;;  %v1587_v30 = vmul.f32 -1.442695, %v252_v28 }
 0x14c   :  { %1857 = vpow2.f32 %v1587_v30 }
 0x154   :  { %v1856_v29 = vpop.eup %1855 }
 0x155   :  { %262 = vrot.lane.b32.xlu0 %v1856_v29, %s2124_s19 }
 0x156   :  { %v1858_v31 = vpop.eup %1857 }
 0x157   :  { %v256_v32 = vadd.f32 1.0, %v1858_v31 }
 0x159   :  { %1859 = vrcp.f32 %v256_v32 }
 0x163   :  { %v1860_v33 = vpop.eup %1859 }
 0x164   :  { %v260_v36 = vmul.f32 0.0, %v1860_v33 }
 0x1c7   :  { %v263_v34 = vpop.permute.xlu0 %262 }
 0x1c8   :  { %v265_v35 = vmul.f32 %v1860_v33, %v263_v34 }
 0x1ca   :  { %267 = vrot.lane.b32.xlu0 %v265_v35, %s2128_s4 }
 0x23c   :  { %v268_v37 = vpop.permute.xlu0 %267 }
 0x23d   :  { %v270_v38 = vadd.f32 %v268_v37, %v260_v36 }
 0x23f   :  { %1861 = vtanh.f32 %v270_v38 }
 0x249   :  { %v1862_v39 = vpop.eup %1861 }
 0x24a   :  { %273 = vrot.lane.b32.xlu1 %v1862_v39, %s2124_s19 }
 0x2bc   :  { %v274_v40 = vpop.permute.xlu1 %273 }
 0x2bd   :  { %v2302_v41 = vmul.f32 %v1860_v33, %v274_v40 }
 0x2bf   :  { %v284_v42 = vpack.c.bf16 %v2302_v41, %v2302_v41 }
 0x2c1   :  { %286 = vrot.lane.b32.xlu1 %v284_v42, %s2128_s4 }
 0x333   :  { %v287_v43 = vpop.permute.xlu1 %286 }
 0x334   :  { %1702 = vmatmul.mubr.msk.bf16.vlgmr.msra.gmra.mrb[4].mxu0 %vm208_vm3, %v287_v43 }
 0x335   :  { %1714 = vmatpush3.bf16.msra.mxu0 %v2275_v10  ;;  %1717 = vmatprep.mubr.msk.bf16.mxu0 %vm2133_vm0, %v2132_v0 }
 0x336   :  { %1715 = vmatprep.subr.bf16.mxu0 %v2132_v0 }
 0x339   :  { %1716 = vmatpush3.bf16.msra.mxu0 %v2277_v11 }
 0x33a   :  { %1729 = vmatprep.subr.bf16.mxu0 %v2132_v0 }
 0x407   :  { %v325_v45 = vpop.f32.mrb[4].mxu0 }
 0x408   :  { %v331_v46 = vadd.f32 %v325_v45, %v283_v44  ;;  %v1703_v47 = vpop.f32.mrb[5].mxu0 }
 0x409   :  { %v328_v48 = vpop.f32.mrb[6].mxu0 }
 0x40a   :  { %1863 = vtanh.f32 %v331_v46  ;;  %v1704_v49 = vpop.f32.mrb[7].mxu0  ;;  %v1589_v51 = vmul.f32 -1.442695, %v331_v46  ;;  %v517_v48 = vld [vmem:[#allocation3 + $0x8] sm:$0x3] }
 0x40c   :  { %1865 = vpow2.f32 %v1589_v51 }
 0x414   :  { %v1864_v50 = vpop.eup %1863 }
 0x415   :  { %341 = vrot.lane.b32.xlu0 %v1864_v50, %s2124_s19 }
 0x416   :  { %v1866_v52 = vpop.eup %1865 }
 0x417   :  { %v335_v53 = vadd.f32 1.0, %v1866_v52 }
 0x419   :  { %1867 = vrcp.f32 %v335_v53 }
 0x423   :  { %v1868_v54 = vpop.eup %1867 }
 0x424   :  { %v339_v57 = vmul.f32 %v1868_v54, %v270_v38 }
 0x487   :  { %v342_v55 = vpop.permute.xlu0 %341 }
 0x488   :  { %v344_v56 = vmul.f32 %v1868_v54, %v342_v55 }
 0x48a   :  { %346 = vrot.lane.b32.xlu1 %v344_v56, %s2128_s4 }
 0x4fc   :  { %v347_v58 = vpop.permute.xlu1 %346 }
 0x4fd   :  { %v349_v59 = vadd.f32 %v347_v58, %v339_v57 }
 0x4ff   :  { %1869 = vtanh.f32 %v349_v59 }
 0x509   :  { %v1870_v60 = vpop.eup %1869 }
 0x50a   :  { %352 = vrot.lane.b32.xlu0 %v1870_v60, %s2124_s19 }
 0x57c   :  { %v353_v61 = vpop.permute.xlu0 %352 }
 0x57d   :  { %v2317_v62 = vmul.f32 %v1868_v54, %v353_v61 }
 0x57f   :  { %v362_v63 = vpack.c.bf16 %v2317_v62, %v2317_v62 }
 0x581   :  { %364 = vrot.lane.b32.xlu1 %v362_v63, %s2128_s4 }
 0x5f3   :  { %v365_v1 = vpop.permute.xlu1 %364 }
 0x5f4   :  { %1710 = vmatmul.mubr.msk.bf16.vlgmr.msra.gmra.mrb[4].mxu1 %vm208_vm3, %v365_v1 }
 0x5f5   :  { %1722 = vmatpush3.bf16.msra.mxu1 %v2275_v10  ;;  %1725 = vmatprep.mubr.msk.bf16.mxu1 %vm2133_vm0, %v2132_v0 }
 0x5f6   :  { %1723 = vmatprep.subr.bf16.mxu1 %v2132_v0 }
 0x5f9   :  { %1724 = vmatpush3.bf16.msra.mxu1 %v2277_v11 }
 0x5fa   :  { %1737 = vmatprep.subr.bf16.mxu1 %v2132_v0 }
 0x6c7   :  { %v403_v3 = vpop.f32.mrb[4].mxu1 }
 0x6c8   :  { %v409_v4 = vadd.f32 %v403_v3, %v361_v2  ;;  %v1711_v5 = vpop.f32.mrb[5].mxu1 }
 0x6c9   :  { %v406_v6 = vpop.f32.mrb[6].mxu1 }
 0x6ca   :  { %1871 = vtanh.f32 %v409_v4  ;;  %v1712_v7 = vpop.f32.mrb[7].mxu1  ;;  %v1591_v9 = vmul.f32 -1.442695, %v409_v4 }
 0x6cb   :  { %v595_v7 = vld [vmem:[#allocation3 + $0xa] sm:$0x3] }
 0x6cc   :  { %1873 = vpow2.f32 %v1591_v9 }
 0x6d4   :  { %v1872_v8 = vpop.eup %1871 }
 0x6d5   :  { %419 = vrot.lane.b32.xlu0 %v1872_v8, %s2124_s19 }
 0x6d6   :  { %v1874_v12 = vpop.eup %1873 }
 0x6d7   :  { %v413_v13 = vadd.f32 1.0, %v1874_v12 }
 0x6d9   :  { %1875 = vrcp.f32 %v413_v13 }
 0x6e3   :  { %v1876_v14 = vpop.eup %1875 }
 0x6e4   :  { %v417_v18 = vmul.f32 %v1876_v14, %v349_v59 }
 0x747   :  { %v420_v16 = vpop.permute.xlu0 %419 }
 0x748   :  { %v422_v17 = vmul.f32 %v1876_v14, %v420_v16 }
 0x74a   :  { %424 = vrot.lane.b32.xlu1 %v422_v17, %s2128_s4 }
 0x7bc   :  { %v425_v19 = vpop.permute.xlu1 %424 }
 0x7bd   :  { %v427_v20 = vadd.f32 %v425_v19, %v417_v18 }
 0x7bf   :  { %1877 = vtanh.f32 %v427_v20 }
 0x7c9   :  { %v1878_v21 = vpop.eup %1877 }
 0x7ca   :  { %430 = vrot.lane.b32.xlu0 %v1878_v21, %s2124_s19 }
 0x83c   :  { %v431_v22 = vpop.permute.xlu0 %430 }
 0x83d   :  { %v2332_v23 = vmul.f32 %v1876_v14, %v431_v22 }
 0x83f   :  { %v440_v24 = vpack.c.bf16 %v2332_v23, %v2332_v23 }
 0x841   :  { %442 = vrot.lane.b32.xlu1 %v440_v24, %s2128_s4 }
 0x8b3   :  { %v443_v25 = vpop.permute.xlu1 %442 }
 0x8b4   :  { %1718 = vmatmul.mubr.msk.bf16.vlgmr.msra.gmra.mrb[8].mxu0 %vm208_vm3, %v443_v25 }
 0x8b5   :  { %1730 = vmatpush3.bf16.msra.mxu0 %v2275_v10  ;;  %1733 = vmatprep.mubr.msk.bf16.mxu0 %vm2133_vm0, %v2132_v0 }
 0x8b6   :  { %1731 = vmatprep.subr.bf16.mxu0 %v2132_v0 }
 0x8b9   :  { %1732 = vmatpush3.bf16.msra.mxu0 %v2277_v11 }
 0x8ba   :  { %1745 = vmatprep.subr.bf16.mxu0 %v2132_v0 }
 0x987   :  { %v481_v27 = vpop.f32.mrb[8].mxu0 }
 0x988   :  { %v487_v28 = vadd.f32 %v481_v27, %v439_v26  ;;  %v1719_v29 = vpop.f32.mrb[9].mxu0 }
 0x989   :  { %v484_v30 = vpop.f32.mrb[10].mxu0 }
 0x98a   :  { %1879 = vtanh.f32 %v487_v28  ;;  %v1720_v31 = vpop.f32.mrb[11].mxu0  ;;  %v1593_v33 = vmul.f32 -1.442695, %v487_v28  ;;  %v673_v30 = vld [vmem:[#allocation3 + $0xc] sm:$0x3] }
 0x98c   :  { %1881 = vpow2.f32 %v1593_v33 }
 0x994   :  { %v1880_v32 = vpop.eup %1879 }
 0x995   :  { %497 = vrot.lane.b32.xlu0 %v1880_v32, %s2124_s19 }
 0x996   :  { %v1882_v34 = vpop.eup %1881 }
 0x997   :  { %v491_v35 = vadd.f32 1.0, %v1882_v34 }
 0x999   :  { %1883 = vrcp.f32 %v491_v35 }
 0x9a3   :  { %v1884_v36 = vpop.eup %1883 }
 0x9a4   :  { %v495_v39 = vmul.f32 %v1884_v36, %v427_v20 }
 0xa07   :  { %v498_v37 = vpop.permute.xlu0 %497 }
 0xa08   :  { %v500_v38 = vmul.f32 %v1884_v36, %v498_v37 }
 0xa0a   :  { %502 = vrot.lane.b32.xlu1 %v500_v38, %s2128_s4 }
 0xa7c   :  { %v503_v40 = vpop.permute.xlu1 %502 }
 0xa7d   :  { %v505_v42 = vadd.f32 %v503_v40, %v495_v39 }
 0xa7f   :  { %1885 = vtanh.f32 %v505_v42 }
 0xa89   :  { %v1886_v43 = vpop.eup %1885 }
 0xa8a   :  { %508 = vrot.lane.b32.xlu0 %v1886_v43, %s2124_s19 }
 0xafc   :  { %v509_v44 = vpop.permute.xlu0 %508 }
 0xafd   :  { %v2347_v45 = vmul.f32 %v1884_v36, %v509_v44 }
 0xaff   :  { %v518_v46 = vpack.c.bf16 %v2347_v45, %v2347_v45 }
 0xb01   :  { %520 = vrot.lane.b32.xlu1 %v518_v46, %s2128_s4 }
 0xb73   :  { %v521_v47 = vpop.permute.xlu1 %520 }
 0xb74   :  { %1726 = vmatmul.mubr.msk.bf16.vlgmr.msra.gmra.mrb[8].mxu1 %vm208_vm3, %v521_v47 }
 0xb75   :  { %1738 = vmatpush3.bf16.msra.mxu1 %v2275_v10  ;;  %1741 = vmatprep.mubr.msk.bf16.mxu1 %vm2133_vm0, %v2132_v0 }
 0xb76   :  { %1739 = vmatprep.subr.bf16.mxu1 %v2132_v0 }
 0xb79   :  { %1740 = vmatpush3.bf16.msra.mxu1 %v2277_v11 }
 0xb7a   :  { %1753 = vmatprep.subr.bf16.mxu1 %v2132_v0 }
 0xc47   :  { %v559_v49 = vpop.f32.mrb[8].mxu1 }
 0xc48   :  { %v565_v50 = vadd.f32 %v559_v49, %v517_v48  ;;  %v1727_v51 = vpop.f32.mrb[9].mxu1 }
 0xc49   :  { %v562_v52 = vpop.f32.mrb[10].mxu1 }
 0xc4a   :  { %1887 = vtanh.f32 %v565_v50  ;;  %v1728_v53 = vpop.f32.mrb[11].mxu1  ;;  %v1595_v55 = vmul.f32 -1.442695, %v565_v50 }
 0xc4b   :  { %v751_v53 = vld [vmem:[#allocation3 + $0xe] sm:$0x3] }
 0xc4c   :  { %1889 = vpow2.f32 %v1595_v55 }
 0xc54   :  { %v1888_v54 = vpop.eup %1887 }
 0xc55   :  { %575 = vrot.lane.b32.xlu0 %v1888_v54, %s2124_s19 }
 0xc56   :  { %v1890_v56 = vpop.eup %1889 }
 0xc57   :  { %v569_v57 = vadd.f32 1.0, %v1890_v56 }
 0xc59   :  { %1891 = vrcp.f32 %v569_v57 }
 0xc63   :  { %v1892_v58 = vpop.eup %1891 }
 0xc64   :  { %v573_v61 = vmul.f32 %v1892_v58, %v505_v42 }
 0xcc7   :  { %v576_v59 = vpop.permute.xlu0 %575 }
 0xcc8   :  { %v578_v60 = vmul.f32 %v1892_v58, %v576_v59 }
 0xcca   :  { %580 = vrot.lane.b32.xlu1 %v578_v60, %s2128_s4 }
 0xd3c   :  { %v581_v63 = vpop.permute.xlu1 %580 }
 0xd3d   :  { %v583_v1 = vadd.f32 %v581_v63, %v573_v61 }
 0xd3f   :  { %1893 = vtanh.f32 %v583_v1 }
 0xd49   :  { %v1894_v2 = vpop.eup %1893 }
 0xd4a   :  { %586 = vrot.lane.b32.xlu0 %v1894_v2, %s2124_s19 }
 0xdbc   :  { %v587_v3 = vpop.permute.xlu0 %586 }
 0xdbd   :  { %v2362_v4 = vmul.f32 %v1892_v58, %v587_v3 }
 0xdbf   :  { %v596_v5 = vpack.c.bf16 %v2362_v4, %v2362_v4 }
 0xdc1   :  { %598 = vrot.lane.b32.xlu1 %v596_v5, %s2128_s4 }
 0xe33   :  { %v599_v6 = vpop.permute.xlu1 %598 }
 0xe34   :  { %1734 = vmatmul.mubr.msk.bf16.vlgmr.msra.gmra.mrb[12].mxu0 %vm208_vm3, %v599_v6 }
 0xe35   :  { %1746 = vmatpush3.bf16.msra.mxu0 %v2275_v10  ;;  %1749 = vmatprep.mubr.msk.bf16.mxu0 %vm2133_vm0, %v2132_v0 }
 0xe36   :  { %1747 = vmatprep.subr.bf16.mxu0 %v2132_v0 }
 0xe39   :  { %1748 = vmatpush3.bf16.msra.mxu0 %v2277_v11 }
 0xe3a   :  { %1761 = vmatprep.subr.bf16.mxu0 %v2132_v0 }
 0xf07   :  { %v637_v8 = vpop.f32.mrb[12].mxu0 }
 0xf08   :  { %v643_v9 = vadd.f32 %v637_v8, %v595_v7  ;;  %v1735_v12 = vpop.f32.mrb[13].mxu0 }
 0xf09   :  { %v640_v13 = vpop.f32.mrb[14].mxu0 }
 0xf0a   :  { %1895 = vtanh.f32 %v643_v9  ;;  %v1736_v14 = vpop.f32.mrb[15].mxu0  ;;  %v1597_v10 = vmul.f32 -1.442695, %v643_v9  ;;  %v1850_v13 = vld [vmem:[#allocation11 + $0x8] sm:$0xff]  }
 0xf0b   :  { %v2417_v14 = vld [vmem:[%s2542_s5] sm:$0xff]  }
 0xf0c   :  { %1897 = vpow2.f32 %v1597_v10 }
 0xf14   :  { %v1896_v16 = vpop.eup %1895 }
 0xf15   :  { %653 = vrot.lane.b32.xlu0 %v1896_v16, %s2124_s19 }
 0xf16   :  { %v1898_v17 = vpop.eup %1897 }
 0xf17   :  { %v647_v18 = vadd.f32 1.0, %v1898_v17 }
 0xf19   :  { %1899 = vrcp.f32 %v647_v18 }
 0xf23   :  { %v1900_v19 = vpop.eup %1899 }
 0xf24   :  { %v651_v21 = vmul.f32 %v1900_v19, %v583_v1 }
 0xf87   :  { %v654_v20 = vpop.permute.xlu0 %653 }
 0xf88   :  { %v656_v11 = vmul.f32 %v1900_v19, %v654_v20 }
 0xf8a   :  { %658 = vrot.lane.b32.xlu1 %v656_v11, %s2128_s4 }
 0xffc   :  { %v659_v22 = vpop.permute.xlu1 %658 }
 0xffd   :  { %v661_v24 = vadd.f32 %v659_v22, %v651_v21 }
 0xfff   :  { %1901 = vtanh.f32 %v661_v24 }
0x1009   :  { %v1902_v25 = vpop.eup %1901 }
0x100a   :  { %664 = vrot.lane.b32.xlu0 %v1902_v25, %s2124_s19 }
0x107c   :  { %v665_v26 = vpop.permute.xlu0 %664 }
0x107d   :  { %v2377_v27 = vmul.f32 %v1900_v19, %v665_v26  ;;  %v1602_v26 = vld [vmem:[%s2543_s6] ss:$0 sm:$0xff] }
0x107f   :  { %v674_v28 = vpack.c.bf16 %v2377_v27, %v2377_v27 }
0x1081   :  { %676 = vrot.lane.b32.xlu1 %v674_v28, %s2128_s4 }
0x10f3   :  { %v677_v29 = vpop.permute.xlu1 %676 }
0x10f4   :  { %1742 = vmatmul.mubr.msk.bf16.vlgmr.msra.gmra.mrb[12].mxu1 %vm208_vm3, %v677_v29 }
0x10f5   :  { %1757 = vmatprep.mubr.msk.bf16.mxu1 %vm2133_vm0, %v2132_v0 }
0x11c7   :  { %v715_v31 = vpop.f32.mrb[12].mxu1 }
0x11c8   :  { %v721_v32 = vadd.f32 %v715_v31, %v673_v30  ;;  %v1743_v33 = vpop.f32.mrb[13].mxu1 }
0x11c9   :  { %v718_v34 = vpop.f32.mrb[14].mxu1 }
0x11ca   :  { %1903 = vtanh.f32 %v721_v32  ;;  %v1744_v35 = vpop.f32.mrb[15].mxu1  ;;  %v1599_v37 = vmul.f32 -1.442695, %v721_v32 }
0x11cc   :  { %1905 = vpow2.f32 %v1599_v37 }
0x11d4   :  { %v1904_v36 = vpop.eup %1903 }
0x11d5   :  { %731 = vrot.lane.b32.xlu0 %v1904_v36, %s2124_s19 }
0x11d6   :  { %v1906_v38 = vpop.eup %1905 }
0x11d7   :  { %v725_v39 = vadd.f32 1.0, %v1906_v38 }
0x11d9   :  { %1907 = vrcp.f32 %v725_v39 }
0x11e3   :  { %v1908_v40 = vpop.eup %1907 }
0x11e4   :  { %v729_v44 = vmul.f32 %v1908_v40, %v661_v24 }
0x1247   :  { %v732_v42 = vpop.permute.xlu0 %731 }
0x1248   :  { %v734_v43 = vmul.f32 %v1908_v40, %v732_v42 }
0x124a   :  { %736 = vrot.lane.b32.xlu1 %v734_v43, %s2128_s4 }
0x12bc   :  { %v737_v46 = vpop.permute.xlu1 %736 }
0x12bd   :  { %v739_v47 = vadd.f32 %v737_v46, %v729_v44 }
0x12bf   :  { %1909 = vtanh.f32 %v739_v47 }
0x12c9   :  { %v1910_v48 = vpop.eup %1909 }
0x12ca   :  { %742 = vrot.lane.b32.xlu0 %v1910_v48, %s2124_s19 }
0x133c   :  { %v743_v49 = vpop.permute.xlu0 %742 }
0x133d   :  { %v745_v50 = vmul.f32 %v1908_v40, %v743_v49 }
0x133f   :  { %v752_v51 = vpack.c.bf16 %v745_v50, %v745_v50 }
0x1341   :  { %754 = vrot.lane.b32.xlu1 %v752_v51, %s2128_s4 }
0x13b3   :  { %v755_v52 = vpop.permute.xlu1 %754 }
0x13b4   :  { %1750 = vmatmul.mubr.msk.bf16.vlgmr.msra.gmra.mrb[16].mxu0 %vm208_vm3, %v755_v52 }
0x13b5   :  { %1765 = vmatprep.mubr.msk.bf16.mxu0 %vm2133_vm0, %v2132_v0  ;;  %1762 = vmatpush3.bf16.msra.mxu0 %v2417_v14 }
0x13b6   :  { %1763 = vmatprep.subr.bf16.mxu0 %v2132_v0 }
0x1487   :  { %v793_v54 = vpop.f32.mrb[16].mxu0 }
0x1488   :  { %v799_v55 = vadd.f32 %v793_v54, %v751_v53  ;;  %v1751_v56 = vpop.f32.mrb[17].mxu0 }
0x1489   :  { %v796_v57 = vpop.f32.mrb[18].mxu0 }
0x148a   :  { %1911 = vtanh.f32 %v799_v55  ;;  %v1752_v58 = vpop.f32.mrb[19].mxu0  ;;  %v1601_v60 = vmul.f32 -1.442695, %v799_v55 }
0x148c   :  { %1913 = vpow2.f32 %v1601_v60 }
0x1494   :  { %v1912_v59 = vpop.eup %1911 }
0x1495   :  { %809 = vrot.lane.b32.xlu0 %v1912_v59, %s2124_s19 }
0x1496   :  { %v1914_v61 = vpop.eup %1913 }
0x1497   :  { %v803_v63 = vadd.f32 1.0, %v1914_v61 }
0x1499   :  { %1915 = vrcp.f32 %v803_v63 }
0x14a3   :  { %v1916_v1 = vpop.eup %1915 }
0x14a4   :  { %v807_v5 = vmul.f32 %v1916_v1, %v739_v47 }
0x1507   :  { %v810_v2 = vpop.permute.xlu0 %809 }
0x1508   :  { %v812_v3 = vmul.f32 %v1916_v1, %v810_v2 }
0x150a   :  { %814 = vrot.lane.b32.xlu1 %v812_v3, %s2128_s4 }
0x150e   :  { %278 = vrot.lane.b32.xlu1 %v2302_v41, %s2128_s4 }
0x1512   :  { %435 = vrot.lane.b32.xlu1 %v2332_v23, %s2128_s4 }
0x1516   :  { %591 = vrot.lane.b32.xlu1 %v2362_v4, %s2128_s4  ;;  %v1849_v4 = vld [vmem:[#allocation11] sm:$0xff]  }
0x1517   :  { %1754 = vmatpush3.bf16.msra.mxu1 %v1849_v4 }
0x1518   :  { %1755 = vmatprep.subr.bf16.mxu1 %v2132_v0 }
0x151a   :  { %747 = vrot.lane.b32.xlu1 %v745_v50, %s2128_s4 }
0x151b   :  { %1756 = vmatpush3.bf16.msra.mxu1 %v1850_v13 }
0x151c   :  { %1769 = vmatprep.subr.bf16.mxu1 %v2132_v0 }
0x157c   :  { %v815_v6 = vpop.permute.xlu1 %814 }
0x157d   :  { %v817_v7 = vadd.f32 %v815_v6, %v807_v5 }
0x157f   :  { %1917 = vtanh.f32 %v817_v7 }
0x1580   :  { %v279_v8 = vpop.permute.xlu1 %278 }
0x1581   :  { %282 = vst.msk [vmem:[#allocation4] sm:$0x3] %vm281_vm4, %v279_v8 }
0x1584   :  { %v436_v9 = vpop.permute.xlu1 %435 }
0x1585   :  { %438 = vst.msk [vmem:[#allocation4 + $0x4] sm:$0x3] %vm281_vm4, %v436_v9 }
0x1588   :  { %v592_v41 = vpop.permute.xlu1 %591 }
0x1589   :  { %v1918_v12 = vpop.eup %1917  ;;  %594 = vst.msk [vmem:[#allocation4 + $0x8] sm:$0x3] %vm281_vm4, %v592_v41 }
0x158a   :  { %820 = vrot.lane.b32.xlu0 %v1918_v12, %s2124_s19 }
0x158c   :  { %v748_v23 = vpop.permute.xlu1 %747 }
0x158d   :  { %750 = vst.msk [vmem:[#allocation4 + $0xc] sm:$0x3] %vm281_vm4, %v748_v23 }
0x158e   :  { %357 = vrot.lane.b32.xlu0 %v2317_v62, %s2128_s4 }
0x1592   :  { %513 = vrot.lane.b32.xlu0 %v2347_v45, %s2128_s4  ;;  %v2423_v45 = vld [vmem:[%s2542_s5 + $0x8] sm:$0xff]  }
0x1593   :  { %1764 = vmatpush3.bf16.msra.mxu0 %v2423_v45 }
0x1594   :  { %1777 = vmatprep.subr.bf16.mxu0 %v2132_v0 }
0x1596   :  { %669 = vrot.lane.b32.xlu0 %v2377_v27, %s2128_s4  ;;  %1766 = vmatmul.mubr.bf16.vlgmr.msra.gmra.mrb[20].mxu0 %v2134_v15 }
0x1597   :  { %1778 = vmatpush3.bf16.msra.mxu0 %v2417_v14  ;;  %1781 = vmatprep.mubr.msk.bf16.mxu0 %vm2133_vm0, %v2132_v0 }
0x1598   :  { %1779 = vmatprep.subr.bf16.mxu0 %v2132_v0 }
0x159b   :  { %1780 = vmatpush3.bf16.msra.mxu0 %v2423_v45 }
0x159c   :  { %1793 = vmatprep.subr.bf16.mxu0 %v2132_v0 }
0x15fc   :  { %v821_v62 = vpop.permute.xlu0 %820 }
0x15fd   :  { %v823_v16 = vmul.f32 %v1916_v1, %v821_v62 }
0x15ff   :  { %825 = vrot.lane.b32.xlu0 %v823_v16, %s2128_s4 }
0x1600   :  { %v358_v10 = vpop.permute.xlu0 %357 }
0x1601   :  { %360 = vst.msk [vmem:[#allocation4 + $0x2] sm:$0x3] %vm281_vm4, %v358_v10 }
0x1604   :  { %v514_v17 = vpop.permute.xlu0 %513 }
0x1605   :  { %516 = vst.msk [vmem:[#allocation4 + $0x6] sm:$0x3] %vm281_vm4, %v514_v17 }
0x1608   :  { %v670_v18 = vpop.permute.xlu0 %669 }
0x1609   :  { %672 = vst.msk [vmem:[#allocation4 + $0xa] sm:$0x3] %vm281_vm4, %v670_v18 }
0x160c   :  { %v838_v15 = vld [vmem:[#allocation4] sm:$0xff] }
0x1669   :  { %v952_v21 = vpop.f32.mrb[20].mxu0 }
0x166a   :  { %v1767_v22 = vpop.f32.mrb[21].mxu0 }
0x166b   :  { %v955_v24 = vpop.f32.mrb[22].mxu0 }
0x166c   :  { %v1768_v25 = vpop.f32.mrb[23].mxu0 }
0x1671   :  { %v826_v19 = vpop.permute.xlu0 %825 }
0x1672   :  { %828 = vst.msk [vmem:[#allocation4 + $0xe] sm:$0x3] %vm281_vm4, %v826_v19 }
0x1679   :  { %v839_v20 = vld [vmem:[#allocation4 + $0x8] sm:$0xff] }
0x167a   :  { %v840_v11 = vpack.c.bf16 %v839_v20, %v838_v15 }
0x167c   :  { %1758 = vmatmul.mubr.msk.bf16.vlgmr.msra.gmra.mrb[16].mxu1 %vm208_vm3, %v840_v11 }
0x167d   :  { %1770 = vmatpush3.bf16.msra.mxu1 %v2417_v14  ;;  %1773 = vmatprep.mubr.msk.bf16.mxu1 %vm2133_vm0, %v2132_v0 }
0x167e   :  { %1771 = vmatprep.subr.bf16.mxu1 %v2132_v0 }
0x1681   :  { %1772 = vmatpush3.bf16.msra.mxu1 %v2423_v45 }
0x1682   :  { %1785 = vmatprep.subr.bf16.mxu1 %v2132_v0 }
0x174f   :  { %v896_v27 = vpop.f32.mrb[16].mxu1 }
0x1750   :  { %v897_v28 = vadd.f32 %v1602_v26, %v896_v27  ;;  %v1759_v29 = vpop.f32.mrb[17].mxu1 }
0x1751   :  { %v899_v30 = vpop.f32.mrb[18].mxu1 }
0x1752   :  { %903 = vst [vmem:[#allocation3] sm:$0xff] %v897_v28  ;;  %v900_v31 = vadd.f32 %v1602_v26, %v899_v30  ;;  %v1760_v32 = vpop.f32.mrb[19].mxu1 }
0x1754   :  { %904 = vst [vmem:[#allocation3 + $0x8] sm:$0xff] %v900_v31 }
0x1759   :  { %v905_v33 = vld [vmem:[#allocation3] sm:$0x3]  ;;  %v983_v52 = vld [vmem:[#allocation3 + $0x2] sm:$0x3]  ;;  %v1056_v23 = vld [vmem:[#allocation3 + $0x4] sm:$0x3] }
0x175a   :  { %v958_v34 = vadd.f32 %v952_v21, %v905_v33  ;;  %v1129_v31 = vld [vmem:[#allocation3 + $0x6] sm:$0x3] }
0x175c   :  { %1919 = vtanh.f32 %v958_v34  ;;  %v1608_v36 = vmul.f32 -1.442695, %v958_v34 }
0x175e   :  { %1921 = vpow2.f32 %v1608_v36 }
0x1766   :  { %v1920_v35 = vpop.eup %1919 }
0x1767   :  { %968 = vrot.lane.b32.xlu1 %v1920_v35, %s2124_s19 }
0x1768   :  { %v1922_v37 = vpop.eup %1921 }
0x1769   :  { %v962_v38 = vadd.f32 1.0, %v1922_v37 }
0x176b   :  { %1923 = vrcp.f32 %v962_v38 }
0x1775   :  { %v1924_v39 = vpop.eup %1923 }
0x1776   :  { %v966_v43 = vmul.f32 0.0, %v1924_v39 }
0x17d9   :  { %v969_v40 = vpop.permute.xlu1 %968 }
0x17da   :  { %v971_v42 = vmul.f32 %v1924_v39, %v969_v40 }
0x17dc   :  { %973 = vrot.lane.b32.xlu0 %v971_v42, %s2128_s4 }
0x184e   :  { %v974_v44 = vpop.permute.xlu0 %973 }
0x184f   :  { %v976_v46 = vadd.f32 %v974_v44, %v966_v43 }
0x1851   :  { %1925 = vtanh.f32 %v976_v46 }
0x185b   :  { %v1926_v47 = vpop.eup %1925 }
0x185c   :  { %979 = vrot.lane.b32.xlu1 %v1926_v47, %s2124_s19 }
0x18ce   :  { %v980_v48 = vpop.permute.xlu1 %979 }
0x18cf   :  { %v982_v49 = vmul.f32 %v1924_v39, %v980_v48 }
0x18d1   :  { %v984_v50 = vpack.c.bf16 %v982_v49, %v982_v49 }
0x18d3   :  { %986 = vrot.lane.b32.xlu0 %v984_v50, %s2128_s4 }
0x1945   :  { %v987_v51 = vpop.permute.xlu0 %986 }
0x1946   :  { %1774 = vmatmul.mubr.msk.bf16.vlgmr.msra.gmra.mrb[20].mxu1 %vm208_vm3, %v987_v51 }
0x1947   :  { %1786 = vmatpush3.bf16.msra.mxu1 %v2417_v14  ;;  %1789 = vmatprep.mubr.msk.bf16.mxu1 %vm2133_vm0, %v2132_v0 }
0x1948   :  { %1787 = vmatprep.subr.bf16.mxu1 %v2132_v0 }
0x194b   :  { %1788 = vmatpush3.bf16.msra.mxu1 %v2423_v45 }
0x194c   :  { %1801 = vmatprep.subr.bf16.mxu1 %v2132_v0 }
0x1a19   :  { %v1025_v53 = vpop.f32.mrb[20].mxu1 }
0x1a1a   :  { %v1031_v54 = vadd.f32 %v1025_v53, %v983_v52  ;;  %v1775_v55 = vpop.f32.mrb[21].mxu1 }
0x1a1b   :  { %v1028_v56 = vpop.f32.mrb[22].mxu1 }
0x1a1c   :  { %1927 = vtanh.f32 %v1031_v54  ;;  %v1776_v57 = vpop.f32.mrb[23].mxu1  ;;  %v1610_v59 = vmul.f32 -1.442695, %v1031_v54  ;;  %v1202_v54 = vld [vmem:[#allocation3 + $0x8] sm:$0x3] }
0x1a1e   :  { %1929 = vpow2.f32 %v1610_v59 }
0x1a26   :  { %v1928_v58 = vpop.eup %1927 }
0x1a27   :  { %1041 = vrot.lane.b32.xlu1 %v1928_v58, %s2124_s19 }
0x1a28   :  { %v1930_v60 = vpop.eup %1929 }
0x1a29   :  { %v1035_v61 = vadd.f32 1.0, %v1930_v60 }
0x1a2b   :  { %1931 = vrcp.f32 %v1035_v61 }
0x1a35   :  { %v1932_v63 = vpop.eup %1931 }
0x1a36   :  { %v1039_v3 = vmul.f32 %v1932_v63, %v976_v46 }
0x1a99   :  { %v1042_v1 = vpop.permute.xlu1 %1041 }
0x1a9a   :  { %v1044_v2 = vmul.f32 %v1932_v63, %v1042_v1 }
0x1a9c   :  { %1046 = vrot.lane.b32.xlu0 %v1044_v2, %s2128_s4 }
0x1b0e   :  { %v1047_v5 = vpop.permute.xlu0 %1046 }
0x1b0f   :  { %v1049_v6 = vadd.f32 %v1047_v5, %v1039_v3 }
0x1b11   :  { %1933 = vtanh.f32 %v1049_v6 }
0x1b1b   :  { %v1934_v7 = vpop.eup %1933 }
0x1b1c   :  { %1052 = vrot.lane.b32.xlu1 %v1934_v7, %s2124_s19 }
0x1b8e   :  { %v1053_v8 = vpop.permute.xlu1 %1052 }
0x1b8f   :  { %v1055_v9 = vmul.f32 %v1932_v63, %v1053_v8 }
0x1b91   :  { %v1057_v41 = vpack.c.bf16 %v1055_v9, %v1055_v9 }
0x1b93   :  { %1059 = vrot.lane.b32.xlu0 %v1057_v41, %s2128_s4 }
0x1c05   :  { %v1060_v12 = vpop.permute.xlu0 %1059 }
0x1c06   :  { %1782 = vmatmul.mubr.msk.bf16.vlgmr.msra.gmra.mrb[24].mxu0 %vm208_vm3, %v1060_v12 }
0x1c07   :  { %1794 = vmatpush3.bf16.msra.mxu0 %v2417_v14  ;;  %1797 = vmatprep.mubr.msk.bf16.mxu0 %vm2133_vm0, %v2132_v0 }
0x1c08   :  { %1795 = vmatprep.subr.bf16.mxu0 %v2132_v0 }
0x1c0b   :  { %1796 = vmatpush3.bf16.msra.mxu0 %v2423_v45 }
0x1c0c   :  { %1809 = vmatprep.subr.bf16.mxu0 %v2132_v0 }
0x1cd9   :  { %v1098_v4 = vpop.f32.mrb[24].mxu0 }
0x1cda   :  { %v1104_v13 = vadd.f32 %v1098_v4, %v1056_v23  ;;  %v1783_v62 = vpop.f32.mrb[25].mxu0 }
0x1cdb   :  { %v1101_v16 = vpop.f32.mrb[26].mxu0 }
0x1cdc   :  { %1935 = vtanh.f32 %v1104_v13  ;;  %v1784_v10 = vpop.f32.mrb[27].mxu0  ;;  %v1612_v18 = vmul.f32 -1.442695, %v1104_v13  ;;  %v1275_v13 = vld [vmem:[#allocation3 + $0xa] sm:$0x3] }
0x1cde   :  { %1937 = vpow2.f32 %v1612_v18 }
0x1ce6   :  { %v1936_v17 = vpop.eup %1935 }
0x1ce7   :  { %1114 = vrot.lane.b32.xlu1 %v1936_v17, %s2124_s19 }
0x1ce8   :  { %v1938_v19 = vpop.eup %1937 }
0x1ce9   :  { %v1108_v15 = vadd.f32 1.0, %v1938_v19 }
0x1ceb   :  { %1939 = vrcp.f32 %v1108_v15 }
0x1cf5   :  { %v1940_v20 = vpop.eup %1939 }
0x1cf6   :  { %v1112_v22 = vmul.f32 %v1940_v20, %v1049_v6 }
0x1d59   :  { %v1115_v11 = vpop.permute.xlu1 %1114 }
0x1d5a   :  { %v1117_v21 = vmul.f32 %v1940_v20, %v1115_v11 }
0x1d5c   :  { %1119 = vrot.lane.b32.xlu0 %v1117_v21, %s2128_s4 }
0x1dce   :  { %v1120_v24 = vpop.permute.xlu0 %1119 }
0x1dcf   :  { %v1122_v25 = vadd.f32 %v1120_v24, %v1112_v22 }
0x1dd1   :  { %1941 = vtanh.f32 %v1122_v25 }
0x1ddb   :  { %v1942_v26 = vpop.eup %1941 }
0x1ddc   :  { %1125 = vrot.lane.b32.xlu1 %v1942_v26, %s2124_s19 }
0x1e4e   :  { %v1126_v27 = vpop.permute.xlu1 %1125 }
0x1e4f   :  { %v1128_v28 = vmul.f32 %v1940_v20, %v1126_v27 }
0x1e51   :  { %v1130_v29 = vpack.c.bf16 %v1128_v28, %v1128_v28 }
0x1e53   :  { %1132 = vrot.lane.b32.xlu0 %v1130_v29, %s2128_s4 }
0x1ec5   :  { %v1133_v30 = vpop.permute.xlu0 %1132 }
0x1ec6   :  { %1790 = vmatmul.mubr.msk.bf16.vlgmr.msra.gmra.mrb[24].mxu1 %vm208_vm3, %v1133_v30 }
0x1ec7   :  { %1802 = vmatpush3.bf16.msra.mxu1 %v2417_v14  ;;  %1805 = vmatprep.mubr.msk.bf16.mxu1 %vm2133_vm0, %v2132_v0 }
0x1ec8   :  { %1803 = vmatprep.subr.bf16.mxu1 %v2132_v0 }
0x1ecb   :  { %1804 = vmatpush3.bf16.msra.mxu1 %v2423_v45 }
0x1ecc   :  { %1817 = vmatprep.subr.bf16.mxu1 %v2132_v0 }
0x1f99   :  { %v1171_v32 = vpop.f32.mrb[24].mxu1 }
0x1f9a   :  { %v1177_v33 = vadd.f32 %v1171_v32, %v1129_v31  ;;  %v1791_v34 = vpop.f32.mrb[25].mxu1  ;;  %v1348_v31 = vld [vmem:[#allocation3 + $0xc] sm:$0x3] }
0x1f9b   :  { %v1174_v35 = vpop.f32.mrb[26].mxu1 }
0x1f9c   :  { %1943 = vtanh.f32 %v1177_v33  ;;  %v1792_v36 = vpop.f32.mrb[27].mxu1  ;;  %v1614_v38 = vmul.f32 -1.442695, %v1177_v33 }
0x1f9e   :  { %1945 = vpow2.f32 %v1614_v38 }
0x1fa6   :  { %v1944_v37 = vpop.eup %1943 }
0x1fa7   :  { %1187 = vrot.lane.b32.xlu1 %v1944_v37, %s2124_s19 }
0x1fa8   :  { %v1946_v39 = vpop.eup %1945 }
0x1fa9   :  { %v1181_v40 = vadd.f32 1.0, %v1946_v39 }
0x1fab   :  { %1947 = vrcp.f32 %v1181_v40 }
0x1fb5   :  { %v1948_v42 = vpop.eup %1947 }
0x1fb6   :  { %v1185_v46 = vmul.f32 %v1948_v42, %v1122_v25 }
0x2019   :  { %v1188_v43 = vpop.permute.xlu1 %1187 }
0x201a   :  { %v1190_v44 = vmul.f32 %v1948_v42, %v1188_v43 }
0x201c   :  { %1192 = vrot.lane.b32.xlu0 %v1190_v44, %s2128_s4 }
0x208e   :  { %v1193_v47 = vpop.permute.xlu0 %1192 }
0x208f   :  { %v1195_v48 = vadd.f32 %v1193_v47, %v1185_v46 }
0x2091   :  { %1949 = vtanh.f32 %v1195_v48 }
0x209b   :  { %v1950_v49 = vpop.eup %1949 }
0x209c   :  { %1198 = vrot.lane.b32.xlu1 %v1950_v49, %s2124_s19 }
0x210e   :  { %v1199_v50 = vpop.permute.xlu1 %1198 }
0x210f   :  { %v1201_v51 = vmul.f32 %v1948_v42, %v1199_v50 }
0x2111   :  { %v1203_v52 = vpack.c.bf16 %v1201_v51, %v1201_v51 }
0x2113   :  { %1205 = vrot.lane.b32.xlu0 %v1203_v52, %s2128_s4 }
0x2185   :  { %v1206_v53 = vpop.permute.xlu0 %1205 }
0x2186   :  { %1798 = vmatmul.mubr.msk.bf16.vlgmr.msra.gmra.mrb[28].mxu0 %vm208_vm3, %v1206_v53 }
0x2187   :  { %1810 = vmatpush3.bf16.msra.mxu0 %v2417_v14  ;;  %1813 = vmatprep.mubr.msk.bf16.mxu0 %vm2133_vm0, %v2132_v0 }
0x2188   :  { %1811 = vmatprep.subr.bf16.mxu0 %v2132_v0 }
0x218b   :  { %1812 = vmatpush3.bf16.msra.mxu0 %v2423_v45 }
0x218c   :  { %1825 = vmatprep.subr.bf16.mxu0 %v2132_v0 }
0x2259   :  { %v1244_v55 = vpop.f32.mrb[28].mxu0 }
0x225a   :  { %v1250_v56 = vadd.f32 %v1244_v55, %v1202_v54  ;;  %v1799_v57 = vpop.f32.mrb[29].mxu0  ;;  %v1421_v54 = vld [vmem:[#allocation3 + $0xe] sm:$0x3] }
0x225b   :  { %v1247_v58 = vpop.f32.mrb[30].mxu0 }
0x225c   :  { %1951 = vtanh.f32 %v1250_v56  ;;  %v1800_v59 = vpop.f32.mrb[31].mxu0  ;;  %v1616_v61 = vmul.f32 -1.442695, %v1250_v56 }
0x225e   :  { %1953 = vpow2.f32 %v1616_v61 }
0x2266   :  { %v1952_v60 = vpop.eup %1951 }
0x2267   :  { %1260 = vrot.lane.b32.xlu1 %v1952_v60, %s2124_s19 }
0x2268   :  { %v1954_v63 = vpop.eup %1953 }
0x2269   :  { %v1254_v1 = vadd.f32 1.0, %v1954_v63 }
0x226b   :  { %1955 = vrcp.f32 %v1254_v1 }
0x2275   :  { %v1956_v2 = vpop.eup %1955 }
0x2276   :  { %v1258_v6 = vmul.f32 %v1956_v2, %v1195_v48 }
0x22d9   :  { %v1261_v3 = vpop.permute.xlu1 %1260 }
0x22da   :  { %v1263_v5 = vmul.f32 %v1956_v2, %v1261_v3 }
0x22dc   :  { %1265 = vrot.lane.b32.xlu0 %v1263_v5, %s2128_s4 }
0x234e   :  { %v1266_v7 = vpop.permute.xlu0 %1265 }
0x234f   :  { %v1268_v8 = vadd.f32 %v1266_v7, %v1258_v6 }
0x2351   :  { %1957 = vtanh.f32 %v1268_v8 }
0x235b   :  { %v1958_v9 = vpop.eup %1957 }
0x235c   :  { %1271 = vrot.lane.b32.xlu1 %v1958_v9, %s2124_s19  ;;  %v1853_v9 = vld [vmem:[#allocation13] sm:$0xff]  }
0x23ce   :  { %v1272_v41 = vpop.permute.xlu1 %1271 }
0x23cf   :  { %v1274_v12 = vmul.f32 %v1956_v2, %v1272_v41  ;;  %v1854_v41 = vld [vmem:[#allocation13 + $0x8] sm:$0xff]  }
0x23d1   :  { %v1276_v23 = vpack.c.bf16 %v1274_v12, %v1274_v12 }
0x23d3   :  { %1278 = vrot.lane.b32.xlu0 %v1276_v23, %s2128_s4 }
0x2445   :  { %v1279_v4 = vpop.permute.xlu0 %1278 }
0x2446   :  { %1806 = vmatmul.mubr.msk.bf16.vlgmr.msra.gmra.mrb[28].mxu1 %vm208_vm3, %v1279_v4 }
0x2447   :  { %1818 = vmatpush3.bf16.msra.mxu1 %v2417_v14  ;;  %1821 = vmatprep.mubr.msk.bf16.mxu1 %vm2133_vm0, %v2132_v0 }
0x2448   :  { %1819 = vmatprep.subr.bf16.mxu1 %v2132_v0 }
0x244b   :  { %1820 = vmatpush3.bf16.msra.mxu1 %v2423_v45 }
0x2519   :  { %v1317_v62 = vpop.f32.mrb[28].mxu1 }
0x251a   :  { %v1323_v16 = vadd.f32 %v1317_v62, %v1275_v13  ;;  %v1807_v10 = vpop.f32.mrb[29].mxu1 }
0x251b   :  { %v1320_v17 = vpop.f32.mrb[30].mxu1 }
0x251c   :  { %1959 = vtanh.f32 %v1323_v16  ;;  %v1808_v18 = vpop.f32.mrb[31].mxu1  ;;  %v1618_v15 = vmul.f32 -1.442695, %v1323_v16  ;;  %v1623_v16 = vld [vmem:[%s2545_s8] ss:$0 sm:$0xff] }
0x251e   :  { %1961 = vpow2.f32 %v1618_v15 }
0x2526   :  { %v1960_v19 = vpop.eup %1959 }
0x2527   :  { %1333 = vrot.lane.b32.xlu1 %v1960_v19, %s2124_s19 }
0x2528   :  { %v1962_v14 = vpop.eup %1961 }
0x2529   :  { %v1327_v20 = vadd.f32 1.0, %v1962_v14 }
0x252b   :  { %1963 = vrcp.f32 %v1327_v20 }
0x2535   :  { %v1964_v11 = vpop.eup %1963 }
0x2536   :  { %v1331_v45 = vmul.f32 %v1964_v11, %v1268_v8 }
0x2599   :  { %v1334_v21 = vpop.permute.xlu1 %1333 }
0x259a   :  { %v1336_v22 = vmul.f32 %v1964_v11, %v1334_v21 }
0x259c   :  { %1338 = vrot.lane.b32.xlu0 %v1336_v22, %s2128_s4 }
0x260e   :  { %v1339_v24 = vpop.permute.xlu0 %1338 }
0x260f   :  { %v1341_v25 = vadd.f32 %v1339_v24, %v1331_v45 }
0x2611   :  { %1965 = vtanh.f32 %v1341_v25 }
0x261b   :  { %v1966_v26 = vpop.eup %1965 }
0x261c   :  { %1344 = vrot.lane.b32.xlu1 %v1966_v26, %s2124_s19 }
0x268e   :  { %v1345_v27 = vpop.permute.xlu1 %1344 }
0x268f   :  { %v1347_v28 = vmul.f32 %v1964_v11, %v1345_v27 }
0x2691   :  { %v1349_v29 = vpack.c.bf16 %v1347_v28, %v1347_v28 }
0x2693   :  { %1351 = vrot.lane.b32.xlu0 %v1349_v29, %s2128_s4 }
0x2705   :  { %v1352_v30 = vpop.permute.xlu0 %1351 }
0x2706   :  { %1814 = vmatmul.mubr.msk.bf16.vlgmr.msra.gmra.mrb[32].mxu0 %vm208_vm3, %v1352_v30 }
0x2707   :  { %1829 = vmatprep.mubr.msk.bf16.mxu0 %vm2133_vm0, %v2132_v0  ;;  %1826 = vmatpush3.bf16.msra.mxu0 %v1853_v9 }
0x2708   :  { %1827 = vmatprep.subr.bf16.mxu0 %v2132_v0 }
0x270b   :  { %1828 = vmatpush3.bf16.msra.mxu0 %v1854_v41 }
0x27d9   :  { %v1390_v32 = vpop.f32.mrb[32].mxu0 }
0x27da   :  { %v1396_v33 = vadd.f32 %v1390_v32, %v1348_v31  ;;  %v1815_v34 = vpop.f32.mrb[33].mxu0 }
0x27db   :  { %v1393_v35 = vpop.f32.mrb[34].mxu0 }
0x27dc   :  { %1967 = vtanh.f32 %v1396_v33  ;;  %v1816_v36 = vpop.f32.mrb[35].mxu0  ;;  %v1620_v38 = vmul.f32 -1.442695, %v1396_v33 }
0x27de   :  { %1969 = vpow2.f32 %v1620_v38 }
0x27e6   :  { %v1968_v37 = vpop.eup %1967 }
0x27e7   :  { %1406 = vrot.lane.b32.xlu1 %v1968_v37, %s2124_s19 }
0x27e8   :  { %v1970_v39 = vpop.eup %1969 }
0x27e9   :  { %v1400_v40 = vadd.f32 1.0, %v1970_v39 }
0x27eb   :  { %1971 = vrcp.f32 %v1400_v40 }
0x27f5   :  { %v1972_v42 = vpop.eup %1971 }
0x27f6   :  { %v1404_v46 = vmul.f32 %v1972_v42, %v1341_v25 }
0x2859   :  { %v1407_v43 = vpop.permute.xlu1 %1406 }
0x285a   :  { %v1409_v44 = vmul.f32 %v1972_v42, %v1407_v43 }
0x285c   :  { %1411 = vrot.lane.b32.xlu0 %v1409_v44, %s2128_s4 }
0x28ce   :  { %v1412_v47 = vpop.permute.xlu0 %1411 }
0x28cf   :  { %v1414_v48 = vadd.f32 %v1412_v47, %v1404_v46 }
0x28d1   :  { %1973 = vtanh.f32 %v1414_v48 }
0x28db   :  { %v1974_v49 = vpop.eup %1973 }
0x28dc   :  { %1417 = vrot.lane.b32.xlu1 %v1974_v49, %s2124_s19 }
0x294e   :  { %v1418_v50 = vpop.permute.xlu1 %1417 }
0x294f   :  { %v1420_v51 = vmul.f32 %v1972_v42, %v1418_v50 }
0x2951   :  { %v1422_v52 = vpack.c.bf16 %v1420_v51, %v1420_v51 }
0x2953   :  { %1424 = vrot.lane.b32.xlu0 %v1422_v52, %s2128_s4 }
0x29c5   :  { %v1425_v53 = vpop.permute.xlu0 %1424 }
0x29c6   :  { %1822 = vmatmul.mubr.msk.bf16.vlgmr.msra.gmra.mrb[32].mxu1 %vm208_vm3, %v1425_v53 }
0x2a99   :  { %v1463_v55 = vpop.f32.mrb[32].mxu1 }
0x2a9a   :  { %v1469_v56 = vadd.f32 %v1463_v55, %v1421_v54  ;;  %v1823_v57 = vpop.f32.mrb[33].mxu1 }
0x2a9b   :  { %v1466_v58 = vpop.f32.mrb[34].mxu1 }
0x2a9c   :  { %1975 = vtanh.f32 %v1469_v56  ;;  %v1824_v59 = vpop.f32.mrb[35].mxu1  ;;  %v1622_v61 = vmul.f32 -1.442695, %v1469_v56 }
0x2a9e   :  { %1977 = vpow2.f32 %v1622_v61 }
0x2aa6   :  { %v1976_v60 = vpop.eup %1975 }
0x2aa7   :  { %1479 = vrot.lane.b32.xlu1 %v1976_v60, %s2124_s19 }
0x2aa8   :  { %v1978_v63 = vpop.eup %1977 }
0x2aa9   :  { %v1473_v1 = vadd.f32 1.0, %v1978_v63 }
0x2aab   :  { %1979 = vrcp.f32 %v1473_v1 }
0x2ab5   :  { %v1980_v2 = vpop.eup %1979 }
0x2ab6   :  { %v1477_v6 = vmul.f32 %v1980_v2, %v1414_v48 }
0x2b19   :  { %v1480_v3 = vpop.permute.xlu1 %1479 }
0x2b1a   :  { %v1482_v5 = vmul.f32 %v1980_v2, %v1480_v3 }
0x2b1c   :  { %1484 = vrot.lane.b32.xlu0 %v1482_v5, %s2128_s4 }
0x2b8e   :  { %v1485_v7 = vpop.permute.xlu0 %1484 }
0x2b8f   :  { %v1487_v8 = vadd.f32 %v1485_v7, %v1477_v6 }
0x2b91   :  { %1981 = vtanh.f32 %v1487_v8 }
0x2b9b   :  { %v1982_v12 = vpop.eup %1981 }
0x2b9c   :  { %1490 = vrot.lane.b32.xlu1 %v1982_v12, %s2124_s19  ;;  %s2093_s19 = scalar_lea.vmem %s1572_s15, 32 }
0x2b9d   :  { %p2094_p12 = scmp.ne.s32.totalorder %s1572_s15, %s2093_s19  ;;  %p2099_p0 = scmp.lt.s32.totalorder %s2093_s19, %s2093_s19 }
0x2b9f   :  { %p2100_p1 = por %p2099_p0, %p2098_p13 }
0x2ba1   :  { %p2101_p2 = pnand %p2100_p1, %p2094_p12 }
0x2c0e   :  { %v1491_v23 = vpop.permute.xlu1 %1490 }
0x2c0f   :  { %v1493_v4 = vmul.f32 %v1980_v2, %v1491_v23 }
0x2c11   :  { %v1494_v13 = vpack.c.bf16 %v1493_v4, %v1493_v4 }
0x2c13   :  { %1507 = vrot.lane.b32.xlu0 %v1494_v13, %s2128_s4 }
0x2c85   :  { %v1508_v62 = vpop.permute.xlu0 %1507 }
0x2c86   :  { %1830 = vmatmul.mubr.msk.bf16.vlgmr.msra.gmra.mrb[36].mxu0 %vm208_vm3, %v1508_v62 }
0x2d59   :  { %v1558_v10 = vpop.f32.mrb[36].mxu0 }
0x2d5a   :  { %v1559_v0 = vadd.f32 %v1623_v16, %v1558_v10  ;;  %v1831_v17 = vpop.f32.mrb[37].mxu0 }
0x2d5b   :  { %v1561_v18 = vpop.f32.mrb[38].mxu0 }
0x2d5c   :  { %1564 = vst [vmem:[#allocation14] sm:$0x3] %v1559_v0  ;;  %v1832_v19 = vpop.f32.mrb[39].mxu0 }
0x2d5d   :  { %2104 = shalt.err (!%p2101_p2)
}
0x2d5e   :  { %s2105_s8 = scalar_lea.hbm %s2546_s9, 32 }
0x2d5f   :  { %p2106_p3 = scmp.ne.s32.totalorder %s2546_s9, %s2105_s8  ;;  %p2109_p4 = scmp.lt.u32.totalorder %s2105_s8, %s2546_s9 }
0x2d61   :  { %p2111_p5 = pnand %p2109_p4, %p2106_p3 }
0x2d63   :  { %2114 = shalt.err (!%p2111_p5)
}
0x2d64   :  { %1574 = dma.vmem_to_hbm [thread:$0]  %s1572_s15, 32, %s2546_s9, [#allocation7]  }
0x2d65   :  { %2121 = dma.done.wait [#allocation7], 32  }
0x2d66   :  { %2122 = vsyncadd [#allocation7], 4294967264 }
0x2d67   :  { %1578 = vsyncpa [#allocation6], 1 }
0x2d68   :  { %1579 = vsyncpa [#allocation9], 1 }
0x2d69   :  { %1580 = vsyncpa [#allocation12], 1 }
0x2d6a   :  { %1581 = vsyncpa [#allocation7], 1 }

</bundles_post_ra>
